<compile_context>
chip_gen: v7x
topology: tpu7x:2x2x1
jax: 0.10.0
libtpu: 0.0.40
codegen_flags: <defaults>
</compile_context>

<pallas_src>
import functools

import jax
import jax.numpy as jnp
from jax.experimental import pallas as pl
from jax.experimental.pallas import tpu as pltpu

NOISE_STD = 0.2 ** 0.5
OUT_PAD = 128  # lane-dense padded width for the 2-class FC output


# ----------------------------------------------------------------------------
# Fused bidirectional LSTM layer kernel (seq-first layout).
#   x:   (T, B, D_in)
#   wih: (D_in, 8H)   columns = [fwd gates i,f,g,o | bwd gates i,f,g,o]
#   whh: (2H, 8H)     block-diagonal: rows 0:H -> fwd cols, rows H:2H -> bwd cols
#   b:   (1, 8H)      (b_ih + b_hh) per direction, folded into input projection
#   out: (T, B, 2H)   [h_fwd | h_bwd] per timestep (PyTorch bidirectional layout)
# ----------------------------------------------------------------------------
def _bilstm_layer_kernel(x_ref, wih_ref, whh_ref, b_ref, out_ref,
                         gx_scr, h_scr, c_scr, *, hidden_dim):
    T, B, D_in = x_ref.shape
    H = hidden_dim
    G = 4 * H

    # Hoisted input projection (+ bias) for BOTH directions in one wide matmul.
    gx = jnp.dot(x_ref[...].reshape(T * B, D_in), wih_ref[...],
                 preferred_element_type=jnp.float32) + b_ref[...]
    gx_scr[...] = gx.reshape(T, B, 2 * G)

    h_scr[...] = jnp.zeros_like(h_scr)
    c_scr[...] = jnp.zeros_like(c_scr)
    whh = whh_ref[...]                       # (2H, 8H)

    # Recurrence, fully unrolled (T static & small).  Iteration i advances the
    # forward direction at time i and the backward direction at time T-1-i,
    # using a single (B,2H)x(2H,8H) hidden matmul for both directions.
    for i in range(T):
        gates_h = jnp.dot(h_scr[...], whh, preferred_element_type=jnp.float32)
        for d, t in ((0, i), (1, T - 1 - i)):
            blk = (gx_scr[t, :, d * G:(d + 1) * G]
                   + gates_h[:, d * G:(d + 1) * G])            # (B, 4H)
            # PyTorch gate order (i, f, g, o).
            # TODO(synk): H=32 gate slices are sub-128-lane; negligible at toy sizes.
            i_g = jax.nn.sigmoid(blk[:, 0 * H:1 * H])
            f_g = jax.nn.sigmoid(blk[:, 1 * H:2 * H])
            g_g = jnp.tanh(blk[:, 2 * H:3 * H])
            o_g = jax.nn.sigmoid(blk[:, 3 * H:4 * H])
            c_d = f_g * c_scr[:, d * H:(d + 1) * H] + i_g * g_g
            h_d = o_g * jnp.tanh(c_d)
            c_scr[:, d * H:(d + 1) * H] = c_d
            h_scr[:, d * H:(d + 1) * H] = h_d
            out_ref[t, :, d * H:(d + 1) * H] = h_d


def bilstm_layer(x, layer_params):
    """One bidirectional LSTM layer: (T, B, D_in) -> (T, B, 2H)."""
    T, B, D_in = x.shape
    w_ih_f, w_hh_f, b_ih_f, b_hh_f = layer_params['fwd']
    w_ih_b, w_hh_b, b_ih_b, b_hh_b = layer_params['bwd']
    H = w_hh_f.shape[1]

    # Pack per-direction weights into the fused layouts (plain JAX, once/call).
    wih = jnp.concatenate([w_ih_f.T, w_ih_b.T], axis=1)               # (D_in, 8H)
    whh = jnp.zeros((2 * H, 8 * H), jnp.float32)
    whh = whh.at[:H, :4 * H].set(w_hh_f.T).at[H:, 4 * H:].set(w_hh_b.T)
    b = jnp.concatenate([b_ih_f + b_hh_f, b_ih_b + b_hh_b])[None, :]  # (1, 8H)

    vmem = pl.BlockSpec(memory_space=pltpu.MemorySpace.VMEM)
    kernel = functools.partial(_bilstm_layer_kernel, hidden_dim=H)
    return pl.pallas_call(
        kernel,
        out_shape=jax.ShapeDtypeStruct((T, B, 2 * H), jnp.float32),
        in_specs=[vmem, vmem, vmem, vmem],
        out_specs=vmem,
        scratch_shapes=[pltpu.VMEM((T, B, 8 * H), jnp.float32),   # hoisted GX
                        pltpu.VMEM((B, 2 * H), jnp.float32),      # h state
                        pltpu.VMEM((B, 2 * H), jnp.float32)],     # c state
    )(x, wih, whh, b)


def bilstm(x, lstm_params):
    """Multi-layer bidirectional LSTM. x: (T, B, E) -> (T, B, 2H)."""
    out = x
    for layer in lstm_params:
        out = bilstm_layer(out, layer)
        # TODO(synk): inter-layer dropout(0.2) is identity in eval mode.
    return out


# ----------------------------------------------------------------------------
# Fused noise-add + topic-mean + concat + attention + Linear kernel.
#   y:       (T, 2B, 2H)  stacked [text | topic] LSTM output, seq-first
#   noise:   (T, 2B, 2H)  standard normal
#   w_omega: (4H, 4H)   u_omega_row: (1, 4H)
#   fcw_pad: (4H, OUT_PAD)   fcb_pad: (1, OUT_PAD)
#   out:     (B, OUT_PAD)   (first 2 columns are the logits)
# ----------------------------------------------------------------------------
def _attn_fc_kernel(y_ref, noise_ref, w_omega_ref, u_omega_ref,
                    fcw_ref, fcb_ref, out_ref, *, batch):
    T, B2, H2 = y_ref.shape
    B = batch
    D = 2 * H2                                                  # 4H

    y = y_ref[...] + jnp.float32(NOISE_STD) * noise_ref[...]    # noise on both
    text = y[:, :B, :]                                          # (T, B, 2H)
    topic = y[:, B:, :]                                         # (T, B, 2H)
    topic_mean = jnp.mean(topic, axis=0)                        # (B, 2H)

    x_cat = jnp.concatenate(
        [text, jnp.broadcast_to(topic_mean[None], (T, B, H2))], axis=-1)  # (T,B,4H)

    u = jnp.tanh(jnp.dot(x_cat.reshape(T * B, D), w_omega_ref[...],
                         preferred_element_type=jnp.float32))   # (T*B, 4H)
    # u @ u_omega as VPU multiply + lane reduction (avoids an N=1 MXU pass).
    att = jnp.sum(u * u_omega_ref[...], axis=-1).reshape(T, B)  # (T, B)
    att_score = jax.nn.softmax(att, axis=0)                     # softmax over seq
    context = jnp.sum(x_cat * att_score[:, :, None], axis=0)    # (B, 4H)

    out_ref[...] = (jnp.dot(context, fcw_ref[...],
                            preferred_element_type=jnp.float32)
                    + fcb_ref[...])                             # (B, OUT_PAD)


def attn_fc(y, noise, w_omega, u_omega, fc_w, fc_b, batch):
    D = w_omega.shape[0]
    # Lane-dense padded FC weights (zeros beyond column 2); slice in wrapper.
    fcw_pad = jnp.zeros((D, OUT_PAD), jnp.float32).at[:, :2].set(fc_w.T)
    fcb_pad = jnp.zeros((1, OUT_PAD), jnp.float32).at[:, :2].set(fc_b[None, :])

    vmem = pl.BlockSpec(memory_space=pltpu.MemorySpace.VMEM)
    out_pad = pl.pallas_call(
        functools.partial(_attn_fc_kernel, batch=batch),
        out_shape=jax.ShapeDtypeStruct((batch, OUT_PAD), jnp.float32),
        in_specs=[vmem, vmem, vmem, vmem, vmem, vmem],
        out_specs=vmem,
    )(y, noise, w_omega, u_omega.reshape(1, D), fcw_pad, fcb_pad)
    return out_pad[:, :2]


# ----------------------------------------------------------------------------
# Full forward pass (mirrors BiLSTM_Attention.forward, eval mode).
# ----------------------------------------------------------------------------
def forward(params, x1, x2, noise_key):
    emb = params['embedding']
    emb_text = emb[x1]                       # (T, B, E)
    emb_topic = emb[x2]                      # (T, B, E)
    # TODO(synk): dropout(0.5) on embeddings is identity in eval mode.

    B = x1.shape[1]
    # Text & topic share LSTM weights -> stack along batch and run once.
    x = jnp.concatenate([emb_text, emb_topic], axis=1)   # (T, 2B, E)
    y = bilstm(x, params['lstm'])                        # (T, 2B, 2H)

    # Gaussian noise (added to both outputs inside the attention kernel),
    # matching `out + sqrt(0.2) * randn(out.shape)` in the reference.
    noise = jax.random.normal(noise_key, y.shape, jnp.float32)

    logits = attn_fc(y, noise, params['w_omega'], params['u_omega'],
                     params['fc_w'], params['fc_b'], B)
    return logits


# ----------------------------------------------------------------------------
# Deterministic parameter initialization (shapes from the module's __init__).
# ----------------------------------------------------------------------------
def _uniform(key, shape, a, b):
    return jax.random.uniform(key, shape, jnp.float32, a, b)


def init_params(key, vocab_size, embedding_dim, hidden_dim, n_layers):
    ks = iter(jax.random.split(key, 64))
    params = {}
    params['embedding'] = jax.random.normal(next(ks),
                                            (vocab_size, embedding_dim),
                                            jnp.float32)
    bound = 1.0 / (hidden_dim ** 0.5)
    lstm_layers = []
    for layer in range(n_layers):
        in_dim = embedding_dim if layer == 0 else 2 * hidden_dim
        layer_p = {}
        for direction in ('fwd', 'bwd'):
            w_ih = _uniform(next(ks), (4 * hidden_dim, in_dim), -bound, bound)
            w_hh = _uniform(next(ks), (4 * hidden_dim, hidden_dim), -bound, bound)
            b_ih = _uniform(next(ks), (4 * hidden_dim,), -bound, bound)
            b_hh = _uniform(next(ks), (4 * hidden_dim,), -bound, bound)
            layer_p[direction] = (w_ih, w_hh, b_ih, b_hh)
        lstm_layers.append(layer_p)
    params['lstm'] = lstm_layers
    params['w_omega'] = _uniform(next(ks), (4 * hidden_dim, 4 * hidden_dim),
                                 -0.1, 0.1)
    params['u_omega'] = _uniform(next(ks), (4 * hidden_dim, 1), -0.1, 0.1)
    fb = 1.0 / ((4 * hidden_dim) ** 0.5)
    params['fc_w'] = _uniform(next(ks), (2, 4 * hidden_dim), -fb, fb)
    params['fc_b'] = _uniform(next(ks), (2,), -fb, fb)
    return params


if __name__ == "__main__":
    vocab_size, embedding_dim, hidden_dim, n_layers = 50, 16, 32, 2
    seq_len, batch = 8, 2

    root = jax.random.PRNGKey(0)
    k_params, k_x1, k_x2, k_noise = jax.random.split(root, 4)

    params = init_params(k_params, vocab_size, embedding_dim, hidden_dim,
                         n_layers)
    x1 = jax.random.randint(k_x1, (seq_len, batch), 0, vocab_size, jnp.int32)
    x2 = jax.random.randint(k_x2, (seq_len, batch), 0, vocab_size, jnp.int32)

    logits = forward(params, x1, x2, k_noise)
    jax.block_until_ready(logits)
    assert logits.shape == (batch, 2) and logits.dtype == jnp.float32
    print("KERNEL_OK")
</pallas_src>

<mosaic_0001>
module attributes {stable_mosaic.version = 11 : i64} {
  func.func @_bilstm_layer_kernel(%arg0: memref<8x4x16xf32, #tpu.memory_space<vmem>>, %arg1: memref<16x256xf32, #tpu.memory_space<vmem>>, %arg2: memref<64x256xf32, #tpu.memory_space<vmem>>, %arg3: memref<1x256xf32, #tpu.memory_space<vmem>>, %arg4: memref<8x4x64xf32, #tpu.memory_space<vmem>>, %arg5: memref<8x4x256xf32, #tpu.memory_space<vmem>>, %arg6: memref<4x64xf32, #tpu.memory_space<vmem>>, %arg7: memref<4x64xf32, #tpu.memory_space<vmem>>) attributes {dimension_semantics = [], scalar_prefetch = 0 : i64, scratch_operands = 3 : i64, tpu.core_type = #tpu.core_type<tc>} {
    %c0 = arith.constant 0 : index
    %c0_0 = arith.constant 0 : index
    %c0_1 = arith.constant 0 : index
    %0 = vector.load %arg0[%c0, %c0_0, %c0_1] : memref<8x4x16xf32, #tpu.memory_space<vmem>>, vector<8x4x16xf32>
    %1 = vector.shape_cast %0 : vector<8x4x16xf32> to vector<32x16xf32>
    %c0_2 = arith.constant 0 : index
    %c0_3 = arith.constant 0 : index
    %2 = vector.load %arg1[%c0_2, %c0_3] : memref<16x256xf32, #tpu.memory_space<vmem>>, vector<16x256xf32>
    %cst = arith.constant dense<0.000000e+00> : vector<32x256xf32>
    %3 = tpu.matmul %1, %2, %cst {dimension_numbers = #tpu.dot_dimension_numbers<[1], [0], [0], [1], [0, 0, 1, 1], [], []>} : vector<32x16xf32>, vector<16x256xf32>, vector<32x256xf32> -> vector<32x256xf32>
    %c0_4 = arith.constant 0 : index
    %c0_5 = arith.constant 0 : index
    %4 = vector.load %arg3[%c0_4, %c0_5] : memref<1x256xf32, #tpu.memory_space<vmem>>, vector<1x256xf32>
    %5 = vector.broadcast %4 : vector<1x256xf32> to vector<32x256xf32>
    %6 = arith.addf %3, %5 : vector<32x256xf32>
    %7 = vector.shape_cast %6 : vector<32x256xf32> to vector<8x4x256xf32>
    %c0_6 = arith.constant 0 : index
    %c0_7 = arith.constant 0 : index
    %c0_8 = arith.constant 0 : index
    %8 = vector.load %arg5[%c0_6, %c0_7, %c0_8] : memref<8x4x256xf32, #tpu.memory_space<vmem>>, vector<8x4x256xf32>
    tpu.vector_store %arg5[%c0_6, %c0_7, %c0_8], %7 {strides = array<i32>} : memref<8x4x256xf32, #tpu.memory_space<vmem>>, vector<8x4x256xf32>,
    %cst_9 = arith.constant 0.000000e+00 : f32
    %9 = vector.broadcast %cst_9 : f32 to vector<4x64xf32>
    %c0_10 = arith.constant 0 : index
    %c0_11 = arith.constant 0 : index
    %10 = vector.load %arg6[%c0_10, %c0_11] : memref<4x64xf32, #tpu.memory_space<vmem>>, vector<4x64xf32>
    tpu.vector_store %arg6[%c0_10, %c0_11], %9 {strides = array<i32>} : memref<4x64xf32, #tpu.memory_space<vmem>>, vector<4x64xf32>,
    %cst_12 = arith.constant 0.000000e+00 : f32
    %11 = vector.broadcast %cst_12 : f32 to vector<4x64xf32>
    %c0_13 = arith.constant 0 : index
    %c0_14 = arith.constant 0 : index
    %12 = vector.load %arg7[%c0_13, %c0_14] : memref<4x64xf32, #tpu.memory_space<vmem>>, vector<4x64xf32>
    tpu.vector_store %arg7[%c0_13, %c0_14], %11 {strides = array<i32>} : memref<4x64xf32, #tpu.memory_space<vmem>>, vector<4x64xf32>,
    %c0_15 = arith.constant 0 : index
    %c0_16 = arith.constant 0 : index
    %13 = vector.load %arg2[%c0_15, %c0_16] : memref<64x256xf32, #tpu.memory_space<vmem>>, vector<64x256xf32>
    %c0_17 = arith.constant 0 : index
    %c0_18 = arith.constant 0 : index
    %14 = vector.load %arg6[%c0_17, %c0_18] : memref<4x64xf32, #tpu.memory_space<vmem>>, vector<4x64xf32>
    %cst_19 = arith.constant dense<0.000000e+00> : vector<4x256xf32>
    %15 = tpu.matmul %14, %13, %cst_19 {dimension_numbers = #tpu.dot_dimension_numbers<[1], [0], [0], [1], [0, 0, 1, 1], [], []>} : vector<4x64xf32>, vector<64x256xf32>, vector<4x256xf32> -> vector<4x256xf32>
    %c0_20 = arith.constant 0 : index
    %c0_21 = arith.constant 0 : index
    %c0_22 = arith.constant 0 : index
    %16 = vector.load %arg5[%c0_20, %c0_21, %c0_22] : memref<8x4x256xf32, #tpu.memory_space<vmem>>, vector<1x4x128xf32>
    %17 = vector.shape_cast %16 : vector<1x4x128xf32> to vector<4x128xf32>
    %18 = vector.extract_strided_slice %15 {offsets = [0, 0], sizes = [4, 128], strides = [1, 1]} : vector<4x256xf32> to vector<4x128xf32>
    %19 = arith.addf %17, %18 : vector<4x128xf32>
    %20 = vector.extract_strided_slice %19 {offsets = [0, 0], sizes = [4, 32], strides = [1, 1]} : vector<4x128xf32> to vector<4x32xf32>
    %21 = arith.negf %20 : vector<4x32xf32>
    %22 = math.exp %21 : vector<4x32xf32>
    %cst_23 = arith.constant 1.000000e+00 : f32
    %23 = vector.broadcast %cst_23 : f32 to vector<4x32xf32>
    %24 = arith.addf %23, %22 : vector<4x32xf32>
    %25 = arith.divf %23, %24 : vector<4x32xf32>
    %26 = vector.extract_strided_slice %19 {offsets = [0, 32], sizes = [4, 32], strides = [1, 1]} : vector<4x128xf32> to vector<4x32xf32>
    %27 = arith.negf %26 : vector<4x32xf32>
    %28 = math.exp %27 : vector<4x32xf32>
    %cst_24 = arith.constant 1.000000e+00 : f32
    %29 = vector.broadcast %cst_24 : f32 to vector<4x32xf32>
    %30 = arith.addf %29, %28 : vector<4x32xf32>
    %31 = arith.divf %29, %30 : vector<4x32xf32>
    %32 = vector.extract_strided_slice %19 {offsets = [0, 64], sizes = [4, 32], strides = [1, 1]} : vector<4x128xf32> to vector<4x32xf32>
    %33 = math.tanh %32 : vector<4x32xf32>
    %34 = vector.extract_strided_slice %19 {offsets = [0, 96], sizes = [4, 32], strides = [1, 1]} : vector<4x128xf32> to vector<4x32xf32>
    %35 = arith.negf %34 : vector<4x32xf32>
    %36 = math.exp %35 : vector<4x32xf32>
    %cst_25 = arith.constant 1.000000e+00 : f32
    %37 = vector.broadcast %cst_25 : f32 to vector<4x32xf32>
    %38 = arith.addf %37, %36 : vector<4x32xf32>
    %39 = arith.divf %37, %38 : vector<4x32xf32>
    %c0_26 = arith.constant 0 : index
    %c0_27 = arith.constant 0 : index
    %40 = vector.load %arg7[%c0_26, %c0_27] : memref<4x64xf32, #tpu.memory_space<vmem>>, vector<4x32xf32>
    %41 = arith.mulf %31, %40 : vector<4x32xf32>
    %42 = arith.mulf %25, %33 : vector<4x32xf32>
    %43 = arith.addf %41, %42 : vector<4x32xf32>
    %44 = math.tanh %43 : vector<4x32xf32>
    %45 = arith.mulf %39, %44 : vector<4x32xf32>
    %c0_28 = arith.constant 0 : index
    %c0_29 = arith.constant 0 : index
    %46 = vector.load %arg7[%c0_28, %c0_29] : memref<4x64xf32, #tpu.memory_space<vmem>>, vector<4x32xf32>
    tpu.vector_store %arg7[%c0_28, %c0_29], %43 {strides = array<i32>} : memref<4x64xf32, #tpu.memory_space<vmem>>, vector<4x32xf32>,
    %c0_30 = arith.constant 0 : index
    %c0_31 = arith.constant 0 : index
    %47 = vector.load %arg6[%c0_30, %c0_31] : memref<4x64xf32, #tpu.memory_space<vmem>>, vector<4x32xf32>
    tpu.vector_store %arg6[%c0_30, %c0_31], %45 {strides = array<i32>} : memref<4x64xf32, #tpu.memory_space<vmem>>, vector<4x32xf32>,
    %c0_32 = arith.constant 0 : index
    %c0_33 = arith.constant 0 : index
    %c0_34 = arith.constant 0 : index
    %48 = vector.load %arg4[%c0_32, %c0_33, %c0_34] : memref<8x4x64xf32, #tpu.memory_space<vmem>>, vector<1x4x32xf32>
    %49 = vector.shape_cast %48 : vector<1x4x32xf32> to vector<4x32xf32>
    %50 = vector.shape_cast %45 : vector<4x32xf32> to vector<1x4x32xf32>
    tpu.vector_store %arg4[%c0_32, %c0_33, %c0_34], %50 {strides = array<i32>} : memref<8x4x64xf32, #tpu.memory_space<vmem>>, vector<1x4x32xf32>,
    %c7 = arith.constant 7 : index
    %c0_35 = arith.constant 0 : index
    %c128 = arith.constant 128 : index
    %51 = vector.load %arg5[%c7, %c0_35, %c128] : memref<8x4x256xf32, #tpu.memory_space<vmem>>, vector<1x4x128xf32>
    %52 = vector.shape_cast %51 : vector<1x4x128xf32> to vector<4x128xf32>
    %53 = vector.extract_strided_slice %15 {offsets = [0, 128], sizes = [4, 128], strides = [1, 1]} : vector<4x256xf32> to vector<4x128xf32>
    %54 = arith.addf %52, %53 : vector<4x128xf32>
    %55 = vector.extract_strided_slice %54 {offsets = [0, 0], sizes = [4, 32], strides = [1, 1]} : vector<4x128xf32> to vector<4x32xf32>
    %56 = arith.negf %55 : vector<4x32xf32>
    %57 = math.exp %56 : vector<4x32xf32>
    %cst_36 = arith.constant 1.000000e+00 : f32
    %58 = vector.broadcast %cst_36 : f32 to vector<4x32xf32>
    %59 = arith.addf %58, %57 : vector<4x32xf32>
    %60 = arith.divf %58, %59 : vector<4x32xf32>
    %61 = vector.extract_strided_slice %54 {offsets = [0, 32], sizes = [4, 32], strides = [1, 1]} : vector<4x128xf32> to vector<4x32xf32>
    %62 = arith.negf %61 : vector<4x32xf32>
    %63 = math.exp %62 : vector<4x32xf32>
    %cst_37 = arith.constant 1.000000e+00 : f32
    %64 = vector.broadcast %cst_37 : f32 to vector<4x32xf32>
    %65 = arith.addf %64, %63 : vector<4x32xf32>
    %66 = arith.divf %64, %65 : vector<4x32xf32>
    %67 = vector.extract_strided_slice %54 {offsets = [0, 64], sizes = [4, 32], strides = [1, 1]} : vector<4x128xf32> to vector<4x32xf32>
    %68 = math.tanh %67 : vector<4x32xf32>
    %69 = vector.extract_strided_slice %54 {offsets = [0, 96], sizes = [4, 32], strides = [1, 1]} : vector<4x128xf32> to vector<4x32xf32>
    %70 = arith.negf %69 : vector<4x32xf32>
    %71 = math.exp %70 : vector<4x32xf32>
    %cst_38 = arith.constant 1.000000e+00 : f32
    %72 = vector.broadcast %cst_38 : f32 to vector<4x32xf32>
    %73 = arith.addf %72, %71 : vector<4x32xf32>
    %74 = arith.divf %72, %73 : vector<4x32xf32>
    %c0_39 = arith.constant 0 : index
    %c32 = arith.constant 32 : index
    %75 = vector.load %arg7[%c0_39, %c32] : memref<4x64xf32, #tpu.memory_space<vmem>>, vector<4x32xf32>
    %76 = arith.mulf %66, %75 : vector<4x32xf32>
    %77 = arith.mulf %60, %68 : vector<4x32xf32>
    %78 = arith.addf %76, %77 : vector<4x32xf32>
    %79 = math.tanh %78 : vector<4x32xf32>
    %80 = arith.mulf %74, %79 : vector<4x32xf32>
    %c0_40 = arith.constant 0 : index
    %c32_41 = arith.constant 32 : index
    %81 = vector.load %arg7[%c0_40, %c32_41] : memref<4x64xf32, #tpu.memory_space<vmem>>, vector<4x32xf32>
    tpu.vector_store %arg7[%c0_40, %c32_41], %78 {strides = array<i32>} : memref<4x64xf32, #tpu.memory_space<vmem>>, vector<4x32xf32>,
    %c0_42 = arith.constant 0 : index
    %c32_43 = arith.constant 32 : index
    %82 = vector.load %arg6[%c0_42, %c32_43] : memref<4x64xf32, #tpu.memory_space<vmem>>, vector<4x32xf32>
    tpu.vector_store %arg6[%c0_42, %c32_43], %80 {strides = array<i32>} : memref<4x64xf32, #tpu.memory_space<vmem>>, vector<4x32xf32>,
    %c7_44 = arith.constant 7 : index
    %c0_45 = arith.constant 0 : index
    %c32_46 = arith.constant 32 : index
    %83 = vector.load %arg4[%c7_44, %c0_45, %c32_46] : memref<8x4x64xf32, #tpu.memory_space<vmem>>, vector<1x4x32xf32>
    %84 = vector.shape_cast %83 : vector<1x4x32xf32> to vector<4x32xf32>
    %85 = vector.shape_cast %80 : vector<4x32xf32> to vector<1x4x32xf32>
    tpu.vector_store %arg4[%c7_44, %c0_45, %c32_46], %85 {strides = array<i32>} : memref<8x4x64xf32, #tpu.memory_space<vmem>>, vector<1x4x32xf32>,
    %c0_47 = arith.constant 0 : index
    %c0_48 = arith.constant 0 : index
    %86 = vector.load %arg6[%c0_47, %c0_48] : memref<4x64xf32, #tpu.memory_space<vmem>>, vector<4x64xf32>
    %cst_49 = arith.constant dense<0.000000e+00> : vector<4x256xf32>
    %87 = tpu.matmul %86, %13, %cst_49 {dimension_numbers = #tpu.dot_dimension_numbers<[1], [0], [0], [1], [0, 0, 1, 1], [], []>} : vector<4x64xf32>, vector<64x256xf32>, vector<4x256xf32> -> vector<4x256xf32>
    %c1 = arith.constant 1 : index
    %c0_50 = arith.constant 0 : index
    %c0_51 = arith.constant 0 : index
    %88 = vector.load %arg5[%c1, %c0_50, %c0_51] : memref<8x4x256xf32, #tpu.memory_space<vmem>>, vector<1x4x128xf32>
    %89 = vector.shape_cast %88 : vector<1x4x128xf32> to vector<4x128xf32>
    %90 = vector.extract_strided_slice %87 {offsets = [0, 0], sizes = [4, 128], strides = [1, 1]} : vector<4x256xf32> to vector<4x128xf32>
    %91 = arith.addf %89, %90 : vector<4x128xf32>
    %92 = vector.extract_strided_slice %91 {offsets = [0, 0], sizes = [4, 32], strides = [1, 1]} : vector<4x128xf32> to vector<4x32xf32>
    %93 = arith.negf %92 : vector<4x32xf32>
    %94 = math.exp %93 : vector<4x32xf32>
    %cst_52 = arith.constant 1.000000e+00 : f32
    %95 = vector.broadcast %cst_52 : f32 to vector<4x32xf32>
    %96 = arith.addf %95, %94 : vector<4x32xf32>
    %97 = arith.divf %95, %96 : vector<4x32xf32>
    %98 = vector.extract_strided_slice %91 {offsets = [0, 32], sizes = [4, 32], strides = [1, 1]} : vector<4x128xf32> to vector<4x32xf32>
    %99 = arith.negf %98 : vector<4x32xf32>
    %100 = math.exp %99 : vector<4x32xf32>
    %cst_53 = arith.constant 1.000000e+00 : f32
    %101 = vector.broadcast %cst_53 : f32 to vector<4x32xf32>
    %102 = arith.addf %101, %100 : vector<4x32xf32>
    %103 = arith.divf %101, %102 : vector<4x32xf32>
    %104 = vector.extract_strided_slice %91 {offsets = [0, 64], sizes = [4, 32], strides = [1, 1]} : vector<4x128xf32> to vector<4x32xf32>
    %105 = math.tanh %104 : vector<4x32xf32>
    %106 = vector.extract_strided_slice %91 {offsets = [0, 96], sizes = [4, 32], strides = [1, 1]} : vector<4x128xf32> to vector<4x32xf32>
    %107 = arith.negf %106 : vector<4x32xf32>
    %108 = math.exp %107 : vector<4x32xf32>
    %cst_54 = arith.constant 1.000000e+00 : f32
    %109 = vector.broadcast %cst_54 : f32 to vector<4x32xf32>
    %110 = arith.addf %109, %108 : vector<4x32xf32>
    %111 = arith.divf %109, %110 : vector<4x32xf32>
    %c0_55 = arith.constant 0 : index
    %c0_56 = arith.constant 0 : index
    %112 = vector.load %arg7[%c0_55, %c0_56] : memref<4x64xf32, #tpu.memory_space<vmem>>, vector<4x32xf32>
    %113 = arith.mulf %103, %112 : vector<4x32xf32>
    %114 = arith.mulf %97, %105 : vector<4x32xf32>
    %115 = arith.addf %113, %114 : vector<4x32xf32>
    %116 = math.tanh %115 : vector<4x32xf32>
    %117 = arith.mulf %111, %116 : vector<4x32xf32>
    %c0_57 = arith.constant 0 : index
    %c0_58 = arith.constant 0 : index
    %118 = vector.load %arg7[%c0_57, %c0_58] : memref<4x64xf32, #tpu.memory_space<vmem>>, vector<4x32xf32>
    tpu.vector_store %arg7[%c0_57, %c0_58], %115 {strides = array<i32>} : memref<4x64xf32, #tpu.memory_space<vmem>>, vector<4x32xf32>,
    %c0_59 = arith.constant 0 : index
    %c0_60 = arith.constant 0 : index
    %119 = vector.load %arg6[%c0_59, %c0_60] : memref<4x64xf32, #tpu.memory_space<vmem>>, vector<4x32xf32>
    tpu.vector_store %arg6[%c0_59, %c0_60], %117 {strides = array<i32>} : memref<4x64xf32, #tpu.memory_space<vmem>>, vector<4x32xf32>,
    %c1_61 = arith.constant 1 : index
    %c0_62 = arith.constant 0 : index
    %c0_63 = arith.constant 0 : index
    %120 = vector.load %arg4[%c1_61, %c0_62, %c0_63] : memref<8x4x64xf32, #tpu.memory_space<vmem>>, vector<1x4x32xf32>
    %121 = vector.shape_cast %120 : vector<1x4x32xf32> to vector<4x32xf32>
    %122 = vector.shape_cast %117 : vector<4x32xf32> to vector<1x4x32xf32>
    tpu.vector_store %arg4[%c1_61, %c0_62, %c0_63], %122 {strides = array<i32>} : memref<8x4x64xf32, #tpu.memory_space<vmem>>, vector<1x4x32xf32>,
    %c6 = arith.constant 6 : index
    %c0_64 = arith.constant 0 : index
    %c128_65 = arith.constant 128 : index
    %123 = vector.load %arg5[%c6, %c0_64, %c128_65] : memref<8x4x256xf32, #tpu.memory_space<vmem>>, vector<1x4x128xf32>
    %124 = vector.shape_cast %123 : vector<1x4x128xf32> to vector<4x128xf32>
    %125 = vector.extract_strided_slice %87 {offsets = [0, 128], sizes = [4, 128], strides = [1, 1]} : vector<4x256xf32> to vector<4x128xf32>
    %126 = arith.addf %124, %125 : vector<4x128xf32>
    %127 = vector.extract_strided_slice %126 {offsets = [0, 0], sizes = [4, 32], strides = [1, 1]} : vector<4x128xf32> to vector<4x32xf32>
    %128 = arith.negf %127 : vector<4x32xf32>
    %129 = math.exp %128 : vector<4x32xf32>
    %cst_66 = arith.constant 1.000000e+00 : f32
    %130 = vector.broadcast %cst_66 : f32 to vector<4x32xf32>
    %131 = arith.addf %130, %129 : vector<4x32xf32>
    %132 = arith.divf %130, %131 : vector<4x32xf32>
    %133 = vector.extract_strided_slice %126 {offsets = [0, 32], sizes = [4, 32], strides = [1, 1]} : vector<4x128xf32> to vector<4x32xf32>
    %134 = arith.negf %133 : vector<4x32xf32>
    %135 = math.exp %134 : vector<4x32xf32>
    %cst_67 = arith.constant 1.000000e+00 : f32
    %136 = vector.broadcast %cst_67 : f32 to vector<4x32xf32>
    %137 = arith.addf %136, %135 : vector<4x32xf32>
    %138 = arith.divf %136, %137 : vector<4x32xf32>
    %139 = vector.extract_strided_slice %126 {offsets = [0, 64], sizes = [4, 32], strides = [1, 1]} : vector<4x128xf32> to vector<4x32xf32>
    %140 = math.tanh %139 : vector<4x32xf32>
    %141 = vector.extract_strided_slice %126 {offsets = [0, 96], sizes = [4, 32], strides = [1, 1]} : vector<4x128xf32> to vector<4x32xf32>
    %142 = arith.negf %141 : vector<4x32xf32>
    %143 = math.exp %142 : vector<4x32xf32>
    %cst_68 = arith.constant 1.000000e+00 : f32
    %144 = vector.broadcast %cst_68 : f32 to vector<4x32xf32>
    %145 = arith.addf %144, %143 : vector<4x32xf32>
    %146 = arith.divf %144, %145 : vector<4x32xf32>
    %c0_69 = arith.constant 0 : index
    %c32_70 = arith.constant 32 : index
    %147 = vector.load %arg7[%c0_69, %c32_70] : memref<4x64xf32, #tpu.memory_space<vmem>>, vector<4x32xf32>
    %148 = arith.mulf %138, %147 : vector<4x32xf32>
    %149 = arith.mulf %132, %140 : vector<4x32xf32>
    %150 = arith.addf %148, %149 : vector<4x32xf32>
    %151 = math.tanh %150 : vector<4x32xf32>
    %152 = arith.mulf %146, %151 : vector<4x32xf32>
    %c0_71 = arith.constant 0 : index
    %c32_72 = arith.constant 32 : index
    %153 = vector.load %arg7[%c0_71, %c32_72] : memref<4x64xf32, #tpu.memory_space<vmem>>, vector<4x32xf32>
    tpu.vector_store %arg7[%c0_71, %c32_72], %150 {strides = array<i32>} : memref<4x64xf32, #tpu.memory_space<vmem>>, vector<4x32xf32>,
    %c0_73 = arith.constant 0 : index
    %c32_74 = arith.constant 32 : index
    %154 = vector.load %arg6[%c0_73, %c32_74] : memref<4x64xf32, #tpu.memory_space<vmem>>, vector<4x32xf32>
    tpu.vector_store %arg6[%c0_73, %c32_74], %152 {strides = array<i32>} : memref<4x64xf32, #tpu.memory_space<vmem>>, vector<4x32xf32>,
    %c6_75 = arith.constant 6 : index
    %c0_76 = arith.constant 0 : index
    %c32_77 = arith.constant 32 : index
    %155 = vector.load %arg4[%c6_75, %c0_76, %c32_77] : memref<8x4x64xf32, #tpu.memory_space<vmem>>, vector<1x4x32xf32>
    %156 = vector.shape_cast %155 : vector<1x4x32xf32> to vector<4x32xf32>
    %157 = vector.shape_cast %152 : vector<4x32xf32> to vector<1x4x32xf32>
    tpu.vector_store %arg4[%c6_75, %c0_76, %c32_77], %157 {strides = array<i32>} : memref<8x4x64xf32, #tpu.memory_space<vmem>>, vector<1x4x32xf32>,
    %c0_78 = arith.constant 0 : index
    %c0_79 = arith.constant 0 : index
    %158 = vector.load %arg6[%c0_78, %c0_79] : memref<4x64xf32, #tpu.memory_space<vmem>>, vector<4x64xf32>
    %cst_80 = arith.constant dense<0.000000e+00> : vector<4x256xf32>
    %159 = tpu.matmul %158, %13, %cst_80 {dimension_numbers = #tpu.dot_dimension_numbers<[1], [0], [0], [1], [0, 0, 1, 1], [], []>} : vector<4x64xf32>, vector<64x256xf32>, vector<4x256xf32> -> vector<4x256xf32>
    %c2 = arith.constant 2 : index
    %c0_81 = arith.constant 0 : index
    %c0_82 = arith.constant 0 : index
    %160 = vector.load %arg5[%c2, %c0_81, %c0_82] : memref<8x4x256xf32, #tpu.memory_space<vmem>>, vector<1x4x128xf32>
    %161 = vector.shape_cast %160 : vector<1x4x128xf32> to vector<4x128xf32>
    %162 = vector.extract_strided_slice %159 {offsets = [0, 0], sizes = [4, 128], strides = [1, 1]} : vector<4x256xf32> to vector<4x128xf32>
    %163 = arith.addf %161, %162 : vector<4x128xf32>
    %164 = vector.extract_strided_slice %163 {offsets = [0, 0], sizes = [4, 32], strides = [1, 1]} : vector<4x128xf32> to vector<4x32xf32>
    %165 = arith.negf %164 : vector<4x32xf32>
    %166 = math.exp %165 : vector<4x32xf32>
    %cst_83 = arith.constant 1.000000e+00 : f32
    %167 = vector.broadcast %cst_83 : f32 to vector<4x32xf32>
    %168 = arith.addf %167, %166 : vector<4x32xf32>
    %169 = arith.divf %167, %168 : vector<4x32xf32>
    %170 = vector.extract_strided_slice %163 {offsets = [0, 32], sizes = [4, 32], strides = [1, 1]} : vector<4x128xf32> to vector<4x32xf32>
    %171 = arith.negf %170 : vector<4x32xf32>
    %172 = math.exp %171 : vector<4x32xf32>
    %cst_84 = arith.constant 1.000000e+00 : f32
    %173 = vector.broadcast %cst_84 : f32 to vector<4x32xf32>
    %174 = arith.addf %173, %172 : vector<4x32xf32>
    %175 = arith.divf %173, %174 : vector<4x32xf32>
    %176 = vector.extract_strided_slice %163 {offsets = [0, 64], sizes = [4, 32], strides = [1, 1]} : vector<4x128xf32> to vector<4x32xf32>
    %177 = math.tanh %176 : vector<4x32xf32>
    %178 = vector.extract_strided_slice %163 {offsets = [0, 96], sizes = [4, 32], strides = [1, 1]} : vector<4x128xf32> to vector<4x32xf32>
    %179 = arith.negf %178 : vector<4x32xf32>
    %180 = math.exp %179 : vector<4x32xf32>
    %cst_85 = arith.constant 1.000000e+00 : f32
    %181 = vector.broadcast %cst_85 : f32 to vector<4x32xf32>
    %182 = arith.addf %181, %180 : vector<4x32xf32>
    %183 = arith.divf %181, %182 : vector<4x32xf32>
    %c0_86 = arith.constant 0 : index
    %c0_87 = arith.constant 0 : index
    %184 = vector.load %arg7[%c0_86, %c0_87] : memref<4x64xf32, #tpu.memory_space<vmem>>, vector<4x32xf32>
    %185 = arith.mulf %175, %184 : vector<4x32xf32>
    %186 = arith.mulf %169, %177 : vector<4x32xf32>
    %187 = arith.addf %185, %186 : vector<4x32xf32>
    %188 = math.tanh %187 : vector<4x32xf32>
    %189 = arith.mulf %183, %188 : vector<4x32xf32>
    %c0_88 = arith.constant 0 : index
    %c0_89 = arith.constant 0 : index
    %190 = vector.load %arg7[%c0_88, %c0_89] : memref<4x64xf32, #tpu.memory_space<vmem>>, vector<4x32xf32>
    tpu.vector_store %arg7[%c0_88, %c0_89], %187 {strides = array<i32>} : memref<4x64xf32, #tpu.memory_space<vmem>>, vector<4x32xf32>,
    %c0_90 = arith.constant 0 : index
    %c0_91 = arith.constant 0 : index
    %191 = vector.load %arg6[%c0_90, %c0_91] : memref<4x64xf32, #tpu.memory_space<vmem>>, vector<4x32xf32>
    tpu.vector_store %arg6[%c0_90, %c0_91], %189 {strides = array<i32>} : memref<4x64xf32, #tpu.memory_space<vmem>>, vector<4x32xf32>,
    %c2_92 = arith.constant 2 : index
    %c0_93 = arith.constant 0 : index
    %c0_94 = arith.constant 0 : index
    %192 = vector.load %arg4[%c2_92, %c0_93, %c0_94] : memref<8x4x64xf32, #tpu.memory_space<vmem>>, vector<1x4x32xf32>
    %193 = vector.shape_cast %192 : vector<1x4x32xf32> to vector<4x32xf32>
    %194 = vector.shape_cast %189 : vector<4x32xf32> to vector<1x4x32xf32>
    tpu.vector_store %arg4[%c2_92, %c0_93, %c0_94], %194 {strides = array<i32>} : memref<8x4x64xf32, #tpu.memory_space<vmem>>, vector<1x4x32xf32>,
    %c5 = arith.constant 5 : index
    %c0_95 = arith.constant 0 : index
    %c128_96 = arith.constant 128 : index
    %195 = vector.load %arg5[%c5, %c0_95, %c128_96] : memref<8x4x256xf32, #tpu.memory_space<vmem>>, vector<1x4x128xf32>
    %196 = vector.shape_cast %195 : vector<1x4x128xf32> to vector<4x128xf32>
    %197 = vector.extract_strided_slice %159 {offsets = [0, 128], sizes = [4, 128], strides = [1, 1]} : vector<4x256xf32> to vector<4x128xf32>
    %198 = arith.addf %196, %197 : vector<4x128xf32>
    %199 = vector.extract_strided_slice %198 {offsets = [0, 0], sizes = [4, 32], strides = [1, 1]} : vector<4x128xf32> to vector<4x32xf32>
    %200 = arith.negf %199 : vector<4x32xf32>
    %201 = math.exp %200 : vector<4x32xf32>
    %cst_97 = arith.constant 1.000000e+00 : f32
    %202 = vector.broadcast %cst_97 : f32 to vector<4x32xf32>
    %203 = arith.addf %202, %201 : vector<4x32xf32>
    %204 = arith.divf %202, %203 : vector<4x32xf32>
    %205 = vector.extract_strided_slice %198 {offsets = [0, 32], sizes = [4, 32], strides = [1, 1]} : vector<4x128xf32> to vector<4x32xf32>
    %206 = arith.negf %205 : vector<4x32xf32>
    %207 = math.exp %206 : vector<4x32xf32>
    %cst_98 = arith.constant 1.000000e+00 : f32
    %208 = vector.broadcast %cst_98 : f32 to vector<4x32xf32>
    %209 = arith.addf %208, %207 : vector<4x32xf32>
    %210 = arith.divf %208, %209 : vector<4x32xf32>
    %211 = vector.extract_strided_slice %198 {offsets = [0, 64], sizes = [4, 32], strides = [1, 1]} : vector<4x128xf32> to vector<4x32xf32>
    %212 = math.tanh %211 : vector<4x32xf32>
    %213 = vector.extract_strided_slice %198 {offsets = [0, 96], sizes = [4, 32], strides = [1, 1]} : vector<4x128xf32> to vector<4x32xf32>
    %214 = arith.negf %213 : vector<4x32xf32>
    %215 = math.exp %214 : vector<4x32xf32>
    %cst_99 = arith.constant 1.000000e+00 : f32
    %216 = vector.broadcast %cst_99 : f32 to vector<4x32xf32>
    %217 = arith.addf %216, %215 : vector<4x32xf32>
    %218 = arith.divf %216, %217 : vector<4x32xf32>
    %c0_100 = arith.constant 0 : index
    %c32_101 = arith.constant 32 : index
    %219 = vector.load %arg7[%c0_100, %c32_101] : memref<4x64xf32, #tpu.memory_space<vmem>>, vector<4x32xf32>
    %220 = arith.mulf %210, %219 : vector<4x32xf32>
    %221 = arith.mulf %204, %212 : vector<4x32xf32>
    %222 = arith.addf %220, %221 : vector<4x32xf32>
    %223 = math.tanh %222 : vector<4x32xf32>
    %224 = arith.mulf %218, %223 : vector<4x32xf32>
    %c0_102 = arith.constant 0 : index
    %c32_103 = arith.constant 32 : index
    %225 = vector.load %arg7[%c0_102, %c32_103] : memref<4x64xf32, #tpu.memory_space<vmem>>, vector<4x32xf32>
    tpu.vector_store %arg7[%c0_102, %c32_103], %222 {strides = array<i32>} : memref<4x64xf32, #tpu.memory_space<vmem>>, vector<4x32xf32>,
    %c0_104 = arith.constant 0 : index
    %c32_105 = arith.constant 32 : index
    %226 = vector.load %arg6[%c0_104, %c32_105] : memref<4x64xf32, #tpu.memory_space<vmem>>, vector<4x32xf32>
    tpu.vector_store %arg6[%c0_104, %c32_105], %224 {strides = array<i32>} : memref<4x64xf32, #tpu.memory_space<vmem>>, vector<4x32xf32>,
    %c5_106 = arith.constant 5 : index
    %c0_107 = arith.constant 0 : index
    %c32_108 = arith.constant 32 : index
    %227 = vector.load %arg4[%c5_106, %c0_107, %c32_108] : memref<8x4x64xf32, #tpu.memory_space<vmem>>, vector<1x4x32xf32>
    %228 = vector.shape_cast %227 : vector<1x4x32xf32> to vector<4x32xf32>
    %229 = vector.shape_cast %224 : vector<4x32xf32> to vector<1x4x32xf32>
    tpu.vector_store %arg4[%c5_106, %c0_107, %c32_108], %229 {strides = array<i32>} : memref<8x4x64xf32, #tpu.memory_space<vmem>>, vector<1x4x32xf32>,
    %c0_109 = arith.constant 0 : index
    %c0_110 = arith.constant 0 : index
    %230 = vector.load %arg6[%c0_109, %c0_110] : memref<4x64xf32, #tpu.memory_space<vmem>>, vector<4x64xf32>
    %cst_111 = arith.constant dense<0.000000e+00> : vector<4x256xf32>
    %231 = tpu.matmul %230, %13, %cst_111 {dimension_numbers = #tpu.dot_dimension_numbers<[1], [0], [0], [1], [0, 0, 1, 1], [], []>} : vector<4x64xf32>, vector<64x256xf32>, vector<4x256xf32> -> vector<4x256xf32>
    %c3 = arith.constant 3 : index
    %c0_112 = arith.constant 0 : index
    %c0_113 = arith.constant 0 : index
    %232 = vector.load %arg5[%c3, %c0_112, %c0_113] : memref<8x4x256xf32, #tpu.memory_space<vmem>>, vector<1x4x128xf32>
    %233 = vector.shape_cast %232 : vector<1x4x128xf32> to vector<4x128xf32>
    %234 = vector.extract_strided_slice %231 {offsets = [0, 0], sizes = [4, 128], strides = [1, 1]} : vector<4x256xf32> to vector<4x128xf32>
    %235 = arith.addf %233, %234 : vector<4x128xf32>
    %236 = vector.extract_strided_slice %235 {offsets = [0, 0], sizes = [4, 32], strides = [1, 1]} : vector<4x128xf32> to vector<4x32xf32>
    %237 = arith.negf %236 : vector<4x32xf32>
    %238 = math.exp %237 : vector<4x32xf32>
    %cst_114 = arith.constant 1.000000e+00 : f32
    %239 = vector.broadcast %cst_114 : f32 to vector<4x32xf32>
    %240 = arith.addf %239, %238 : vector<4x32xf32>
    %241 = arith.divf %239, %240 : vector<4x32xf32>
    %242 = vector.extract_strided_slice %235 {offsets = [0, 32], sizes = [4, 32], strides = [1, 1]} : vector<4x128xf32> to vector<4x32xf32>
    %243 = arith.negf %242 : vector<4x32xf32>
    %244 = math.exp %243 : vector<4x32xf32>
    %cst_115 = arith.constant 1.000000e+00 : f32
    %245 = vector.broadcast %cst_115 : f32 to vector<4x32xf32>
    %246 = arith.addf %245, %244 : vector<4x32xf32>
    %247 = arith.divf %245, %246 : vector<4x32xf32>
    %248 = vector.extract_strided_slice %235 {offsets = [0, 64], sizes = [4, 32], strides = [1, 1]} : vector<4x128xf32> to vector<4x32xf32>
    %249 = math.tanh %248 : vector<4x32xf32>
    %250 = vector.extract_strided_slice %235 {offsets = [0, 96], sizes = [4, 32], strides = [1, 1]} : vector<4x128xf32> to vector<4x32xf32>
    %251 = arith.negf %250 : vector<4x32xf32>
    %252 = math.exp %251 : vector<4x32xf32>
    %cst_116 = arith.constant 1.000000e+00 : f32
    %253 = vector.broadcast %cst_116 : f32 to vector<4x32xf32>
    %254 = arith.addf %253, %252 : vector<4x32xf32>
    %255 = arith.divf %253, %254 : vector<4x32xf32>
    %c0_117 = arith.constant 0 : index
    %c0_118 = arith.constant 0 : index
    %256 = vector.load %arg7[%c0_117, %c0_118] : memref<4x64xf32, #tpu.memory_space<vmem>>, vector<4x32xf32>
    %257 = arith.mulf %247, %256 : vector<4x32xf32>
    %258 = arith.mulf %241, %249 : vector<4x32xf32>
    %259 = arith.addf %257, %258 : vector<4x32xf32>
    %260 = math.tanh %259 : vector<4x32xf32>
    %261 = arith.mulf %255, %260 : vector<4x32xf32>
    %c0_119 = arith.constant 0 : index
    %c0_120 = arith.constant 0 : index
    %262 = vector.load %arg7[%c0_119, %c0_120] : memref<4x64xf32, #tpu.memory_space<vmem>>, vector<4x32xf32>
    tpu.vector_store %arg7[%c0_119, %c0_120], %259 {strides = array<i32>} : memref<4x64xf32, #tpu.memory_space<vmem>>, vector<4x32xf32>,
    %c0_121 = arith.constant 0 : index
    %c0_122 = arith.constant 0 : index
    %263 = vector.load %arg6[%c0_121, %c0_122] : memref<4x64xf32, #tpu.memory_space<vmem>>, vector<4x32xf32>
    tpu.vector_store %arg6[%c0_121, %c0_122], %261 {strides = array<i32>} : memref<4x64xf32, #tpu.memory_space<vmem>>, vector<4x32xf32>,
    %c3_123 = arith.constant 3 : index
    %c0_124 = arith.constant 0 : index
    %c0_125 = arith.constant 0 : index
    %264 = vector.load %arg4[%c3_123, %c0_124, %c0_125] : memref<8x4x64xf32, #tpu.memory_space<vmem>>, vector<1x4x32xf32>
    %265 = vector.shape_cast %264 : vector<1x4x32xf32> to vector<4x32xf32>
    %266 = vector.shape_cast %261 : vector<4x32xf32> to vector<1x4x32xf32>
    tpu.vector_store %arg4[%c3_123, %c0_124, %c0_125], %266 {strides = array<i32>} : memref<8x4x64xf32, #tpu.memory_space<vmem>>, vector<1x4x32xf32>,
    %c4 = arith.constant 4 : index
    %c0_126 = arith.constant 0 : index
    %c128_127 = arith.constant 128 : index
    %267 = vector.load %arg5[%c4, %c0_126, %c128_127] : memref<8x4x256xf32, #tpu.memory_space<vmem>>, vector<1x4x128xf32>
    %268 = vector.shape_cast %267 : vector<1x4x128xf32> to vector<4x128xf32>
    %269 = vector.extract_strided_slice %231 {offsets = [0, 128], sizes = [4, 128], strides = [1, 1]} : vector<4x256xf32> to vector<4x128xf32>
    %270 = arith.addf %268, %269 : vector<4x128xf32>
    %271 = vector.extract_strided_slice %270 {offsets = [0, 0], sizes = [4, 32], strides = [1, 1]} : vector<4x128xf32> to vector<4x32xf32>
    %272 = arith.negf %271 : vector<4x32xf32>
    %273 = math.exp %272 : vector<4x32xf32>
    %cst_128 = arith.constant 1.000000e+00 : f32
    %274 = vector.broadcast %cst_128 : f32 to vector<4x32xf32>
    %275 = arith.addf %274, %273 : vector<4x32xf32>
    %276 = arith.divf %274, %275 : vector<4x32xf32>
    %277 = vector.extract_strided_slice %270 {offsets = [0, 32], sizes = [4, 32], strides = [1, 1]} : vector<4x128xf32> to vector<4x32xf32>
    %278 = arith.negf %277 : vector<4x32xf32>
    %279 = math.exp %278 : vector<4x32xf32>
    %cst_129 = arith.constant 1.000000e+00 : f32
    %280 = vector.broadcast %cst_129 : f32 to vector<4x32xf32>
    %281 = arith.addf %280, %279 : vector<4x32xf32>
    %282 = arith.divf %280, %281 : vector<4x32xf32>
    %283 = vector.extract_strided_slice %270 {offsets = [0, 64], sizes = [4, 32], strides = [1, 1]} : vector<4x128xf32> to vector<4x32xf32>
    %284 = math.tanh %283 : vector<4x32xf32>
    %285 = vector.extract_strided_slice %270 {offsets = [0, 96], sizes = [4, 32], strides = [1, 1]} : vector<4x128xf32> to vector<4x32xf32>
    %286 = arith.negf %285 : vector<4x32xf32>
    %287 = math.exp %286 : vector<4x32xf32>
    %cst_130 = arith.constant 1.000000e+00 : f32
    %288 = vector.broadcast %cst_130 : f32 to vector<4x32xf32>
    %289 = arith.addf %288, %287 : vector<4x32xf32>
    %290 = arith.divf %288, %289 : vector<4x32xf32>
    %c0_131 = arith.constant 0 : index
    %c32_132 = arith.constant 32 : index
    %291 = vector.load %arg7[%c0_131, %c32_132] : memref<4x64xf32, #tpu.memory_space<vmem>>, vector<4x32xf32>
    %292 = arith.mulf %282, %291 : vector<4x32xf32>
    %293 = arith.mulf %276, %284 : vector<4x32xf32>
    %294 = arith.addf %292, %293 : vector<4x32xf32>
    %295 = math.tanh %294 : vector<4x32xf32>
    %296 = arith.mulf %290, %295 : vector<4x32xf32>
    %c0_133 = arith.constant 0 : index
    %c32_134 = arith.constant 32 : index
    %297 = vector.load %arg7[%c0_133, %c32_134] : memref<4x64xf32, #tpu.memory_space<vmem>>, vector<4x32xf32>
    tpu.vector_store %arg7[%c0_133, %c32_134], %294 {strides = array<i32>} : memref<4x64xf32, #tpu.memory_space<vmem>>, vector<4x32xf32>,
    %c0_135 = arith.constant 0 : index
    %c32_136 = arith.constant 32 : index
    %298 = vector.load %arg6[%c0_135, %c32_136] : memref<4x64xf32, #tpu.memory_space<vmem>>, vector<4x32xf32>
    tpu.vector_store %arg6[%c0_135, %c32_136], %296 {strides = array<i32>} : memref<4x64xf32, #tpu.memory_space<vmem>>, vector<4x32xf32>,
    %c4_137 = arith.constant 4 : index
    %c0_138 = arith.constant 0 : index
    %c32_139 = arith.constant 32 : index
    %299 = vector.load %arg4[%c4_137, %c0_138, %c32_139] : memref<8x4x64xf32, #tpu.memory_space<vmem>>, vector<1x4x32xf32>
    %300 = vector.shape_cast %299 : vector<1x4x32xf32> to vector<4x32xf32>
    %301 = vector.shape_cast %296 : vector<4x32xf32> to vector<1x4x32xf32>
    tpu.vector_store %arg4[%c4_137, %c0_138, %c32_139], %301 {strides = array<i32>} : memref<8x4x64xf32, #tpu.memory_space<vmem>>, vector<1x4x32xf32>,
    %c0_140 = arith.constant 0 : index
    %c0_141 = arith.constant 0 : index
    %302 = vector.load %arg6[%c0_140, %c0_141] : memref<4x64xf32, #tpu.memory_space<vmem>>, vector<4x64xf32>
    %cst_142 = arith.constant dense<0.000000e+00> : vector<4x256xf32>
    %303 = tpu.matmul %302, %13, %cst_142 {dimension_numbers = #tpu.dot_dimension_numbers<[1], [0], [0], [1], [0, 0, 1, 1], [], []>} : vector<4x64xf32>, vector<64x256xf32>, vector<4x256xf32> -> vector<4x256xf32>
    %c4_143 = arith.constant 4 : index
    %c0_144 = arith.constant 0 : index
    %c0_145 = arith.constant 0 : index
    %304 = vector.load %arg5[%c4_143, %c0_144, %c0_145] : memref<8x4x256xf32, #tpu.memory_space<vmem>>, vector<1x4x128xf32>
    %305 = vector.shape_cast %304 : vector<1x4x128xf32> to vector<4x128xf32>
    %306 = vector.extract_strided_slice %303 {offsets = [0, 0], sizes = [4, 128], strides = [1, 1]} : vector<4x256xf32> to vector<4x128xf32>
    %307 = arith.addf %305, %306 : vector<4x128xf32>
    %308 = vector.extract_strided_slice %307 {offsets = [0, 0], sizes = [4, 32], strides = [1, 1]} : vector<4x128xf32> to vector<4x32xf32>
    %309 = arith.negf %308 : vector<4x32xf32>
    %310 = math.exp %309 : vector<4x32xf32>
    %cst_146 = arith.constant 1.000000e+00 : f32
    %311 = vector.broadcast %cst_146 : f32 to vector<4x32xf32>
    %312 = arith.addf %311, %310 : vector<4x32xf32>
    %313 = arith.divf %311, %312 : vector<4x32xf32>
    %314 = vector.extract_strided_slice %307 {offsets = [0, 32], sizes = [4, 32], strides = [1, 1]} : vector<4x128xf32> to vector<4x32xf32>
    %315 = arith.negf %314 : vector<4x32xf32>
    %316 = math.exp %315 : vector<4x32xf32>
    %cst_147 = arith.constant 1.000000e+00 : f32
    %317 = vector.broadcast %cst_147 : f32 to vector<4x32xf32>
    %318 = arith.addf %317, %316 : vector<4x32xf32>
    %319 = arith.divf %317, %318 : vector<4x32xf32>
    %320 = vector.extract_strided_slice %307 {offsets = [0, 64], sizes = [4, 32], strides = [1, 1]} : vector<4x128xf32> to vector<4x32xf32>
    %321 = math.tanh %320 : vector<4x32xf32>
    %322 = vector.extract_strided_slice %307 {offsets = [0, 96], sizes = [4, 32], strides = [1, 1]} : vector<4x128xf32> to vector<4x32xf32>
    %323 = arith.negf %322 : vector<4x32xf32>
    %324 = math.exp %323 : vector<4x32xf32>
    %cst_148 = arith.constant 1.000000e+00 : f32
    %325 = vector.broadcast %cst_148 : f32 to vector<4x32xf32>
    %326 = arith.addf %325, %324 : vector<4x32xf32>
    %327 = arith.divf %325, %326 : vector<4x32xf32>
    %c0_149 = arith.constant 0 : index
    %c0_150 = arith.constant 0 : index
    %328 = vector.load %arg7[%c0_149, %c0_150] : memref<4x64xf32, #tpu.memory_space<vmem>>, vector<4x32xf32>
    %329 = arith.mulf %319, %328 : vector<4x32xf32>
    %330 = arith.mulf %313, %321 : vector<4x32xf32>
    %331 = arith.addf %329, %330 : vector<4x32xf32>
    %332 = math.tanh %331 : vector<4x32xf32>
    %333 = arith.mulf %327, %332 : vector<4x32xf32>
    %c0_151 = arith.constant 0 : index
    %c0_152 = arith.constant 0 : index
    %334 = vector.load %arg7[%c0_151, %c0_152] : memref<4x64xf32, #tpu.memory_space<vmem>>, vector<4x32xf32>
    tpu.vector_store %arg7[%c0_151, %c0_152], %331 {strides = array<i32>} : memref<4x64xf32, #tpu.memory_space<vmem>>, vector<4x32xf32>,
    %c0_153 = arith.constant 0 : index
    %c0_154 = arith.constant 0 : index
    %335 = vector.load %arg6[%c0_153, %c0_154] : memref<4x64xf32, #tpu.memory_space<vmem>>, vector<4x32xf32>
    tpu.vector_store %arg6[%c0_153, %c0_154], %333 {strides = array<i32>} : memref<4x64xf32, #tpu.memory_space<vmem>>, vector<4x32xf32>,
    %c4_155 = arith.constant 4 : index
    %c0_156 = arith.constant 0 : index
    %c0_157 = arith.constant 0 : index
    %336 = vector.load %arg4[%c4_155, %c0_156, %c0_157] : memref<8x4x64xf32, #tpu.memory_space<vmem>>, vector<1x4x32xf32>
    %337 = vector.shape_cast %336 : vector<1x4x32xf32> to vector<4x32xf32>
    %338 = vector.shape_cast %333 : vector<4x32xf32> to vector<1x4x32xf32>
    tpu.vector_store %arg4[%c4_155, %c0_156, %c0_157], %338 {strides = array<i32>} : memref<8x4x64xf32, #tpu.memory_space<vmem>>, vector<1x4x32xf32>,
    %c3_158 = arith.constant 3 : index
    %c0_159 = arith.constant 0 : index
    %c128_160 = arith.constant 128 : index
    %339 = vector.load %arg5[%c3_158, %c0_159, %c128_160] : memref<8x4x256xf32, #tpu.memory_space<vmem>>, vector<1x4x128xf32>
    %340 = vector.shape_cast %339 : vector<1x4x128xf32> to vector<4x128xf32>
    %341 = vector.extract_strided_slice %303 {offsets = [0, 128], sizes = [4, 128], strides = [1, 1]} : vector<4x256xf32> to vector<4x128xf32>
    %342 = arith.addf %340, %341 : vector<4x128xf32>
    %343 = vector.extract_strided_slice %342 {offsets = [0, 0], sizes = [4, 32], strides = [1, 1]} : vector<4x128xf32> to vector<4x32xf32>
    %344 = arith.negf %343 : vector<4x32xf32>
    %345 = math.exp %344 : vector<4x32xf32>
    %cst_161 = arith.constant 1.000000e+00 : f32
    %346 = vector.broadcast %cst_161 : f32 to vector<4x32xf32>
    %347 = arith.addf %346, %345 : vector<4x32xf32>
    %348 = arith.divf %346, %347 : vector<4x32xf32>
    %349 = vector.extract_strided_slice %342 {offsets = [0, 32], sizes = [4, 32], strides = [1, 1]} : vector<4x128xf32> to vector<4x32xf32>
    %350 = arith.negf %349 : vector<4x32xf32>
    %351 = math.exp %350 : vector<4x32xf32>
    %cst_162 = arith.constant 1.000000e+00 : f32
    %352 = vector.broadcast %cst_162 : f32 to vector<4x32xf32>
    %353 = arith.addf %352, %351 : vector<4x32xf32>
    %354 = arith.divf %352, %353 : vector<4x32xf32>
    %355 = vector.extract_strided_slice %342 {offsets = [0, 64], sizes = [4, 32], strides = [1, 1]} : vector<4x128xf32> to vector<4x32xf32>
    %356 = math.tanh %355 : vector<4x32xf32>
    %357 = vector.extract_strided_slice %342 {offsets = [0, 96], sizes = [4, 32], strides = [1, 1]} : vector<4x128xf32> to vector<4x32xf32>
    %358 = arith.negf %357 : vector<4x32xf32>
    %359 = math.exp %358 : vector<4x32xf32>
    %cst_163 = arith.constant 1.000000e+00 : f32
    %360 = vector.broadcast %cst_163 : f32 to vector<4x32xf32>
    %361 = arith.addf %360, %359 : vector<4x32xf32>
    %362 = arith.divf %360, %361 : vector<4x32xf32>
    %c0_164 = arith.constant 0 : index
    %c32_165 = arith.constant 32 : index
    %363 = vector.load %arg7[%c0_164, %c32_165] : memref<4x64xf32, #tpu.memory_space<vmem>>, vector<4x32xf32>
    %364 = arith.mulf %354, %363 : vector<4x32xf32>
    %365 = arith.mulf %348, %356 : vector<4x32xf32>
    %366 = arith.addf %364, %365 : vector<4x32xf32>
    %367 = math.tanh %366 : vector<4x32xf32>
    %368 = arith.mulf %362, %367 : vector<4x32xf32>
    %c0_166 = arith.constant 0 : index
    %c32_167 = arith.constant 32 : index
    %369 = vector.load %arg7[%c0_166, %c32_167] : memref<4x64xf32, #tpu.memory_space<vmem>>, vector<4x32xf32>
    tpu.vector_store %arg7[%c0_166, %c32_167], %366 {strides = array<i32>} : memref<4x64xf32, #tpu.memory_space<vmem>>, vector<4x32xf32>,
    %c0_168 = arith.constant 0 : index
    %c32_169 = arith.constant 32 : index
    %370 = vector.load %arg6[%c0_168, %c32_169] : memref<4x64xf32, #tpu.memory_space<vmem>>, vector<4x32xf32>
    tpu.vector_store %arg6[%c0_168, %c32_169], %368 {strides = array<i32>} : memref<4x64xf32, #tpu.memory_space<vmem>>, vector<4x32xf32>,
    %c3_170 = arith.constant 3 : index
    %c0_171 = arith.constant 0 : index
    %c32_172 = arith.constant 32 : index
    %371 = vector.load %arg4[%c3_170, %c0_171, %c32_172] : memref<8x4x64xf32, #tpu.memory_space<vmem>>, vector<1x4x32xf32>
    %372 = vector.shape_cast %371 : vector<1x4x32xf32> to vector<4x32xf32>
    %373 = vector.shape_cast %368 : vector<4x32xf32> to vector<1x4x32xf32>
    tpu.vector_store %arg4[%c3_170, %c0_171, %c32_172], %373 {strides = array<i32>} : memref<8x4x64xf32, #tpu.memory_space<vmem>>, vector<1x4x32xf32>,
    %c0_173 = arith.constant 0 : index
    %c0_174 = arith.constant 0 : index
    %374 = vector.load %arg6[%c0_173, %c0_174] : memref<4x64xf32, #tpu.memory_space<vmem>>, vector<4x64xf32>
    %cst_175 = arith.constant dense<0.000000e+00> : vector<4x256xf32>
    %375 = tpu.matmul %374, %13, %cst_175 {dimension_numbers = #tpu.dot_dimension_numbers<[1], [0], [0], [1], [0, 0, 1, 1], [], []>} : vector<4x64xf32>, vector<64x256xf32>, vector<4x256xf32> -> vector<4x256xf32>
    %c5_176 = arith.constant 5 : index
    %c0_177 = arith.constant 0 : index
    %c0_178 = arith.constant 0 : index
    %376 = vector.load %arg5[%c5_176, %c0_177, %c0_178] : memref<8x4x256xf32, #tpu.memory_space<vmem>>, vector<1x4x128xf32>
    %377 = vector.shape_cast %376 : vector<1x4x128xf32> to vector<4x128xf32>
    %378 = vector.extract_strided_slice %375 {offsets = [0, 0], sizes = [4, 128], strides = [1, 1]} : vector<4x256xf32> to vector<4x128xf32>
    %379 = arith.addf %377, %378 : vector<4x128xf32>
    %380 = vector.extract_strided_slice %379 {offsets = [0, 0], sizes = [4, 32], strides = [1, 1]} : vector<4x128xf32> to vector<4x32xf32>
    %381 = arith.negf %380 : vector<4x32xf32>
    %382 = math.exp %381 : vector<4x32xf32>
    %cst_179 = arith.constant 1.000000e+00 : f32
    %383 = vector.broadcast %cst_179 : f32 to vector<4x32xf32>
    %384 = arith.addf %383, %382 : vector<4x32xf32>
    %385 = arith.divf %383, %384 : vector<4x32xf32>
    %386 = vector.extract_strided_slice %379 {offsets = [0, 32], sizes = [4, 32], strides = [1, 1]} : vector<4x128xf32> to vector<4x32xf32>
    %387 = arith.negf %386 : vector<4x32xf32>
    %388 = math.exp %387 : vector<4x32xf32>
    %cst_180 = arith.constant 1.000000e+00 : f32
    %389 = vector.broadcast %cst_180 : f32 to vector<4x32xf32>
    %390 = arith.addf %389, %388 : vector<4x32xf32>
    %391 = arith.divf %389, %390 : vector<4x32xf32>
    %392 = vector.extract_strided_slice %379 {offsets = [0, 64], sizes = [4, 32], strides = [1, 1]} : vector<4x128xf32> to vector<4x32xf32>
    %393 = math.tanh %392 : vector<4x32xf32>
    %394 = vector.extract_strided_slice %379 {offsets = [0, 96], sizes = [4, 32], strides = [1, 1]} : vector<4x128xf32> to vector<4x32xf32>
    %395 = arith.negf %394 : vector<4x32xf32>
    %396 = math.exp %395 : vector<4x32xf32>
    %cst_181 = arith.constant 1.000000e+00 : f32
    %397 = vector.broadcast %cst_181 : f32 to vector<4x32xf32>
    %398 = arith.addf %397, %396 : vector<4x32xf32>
    %399 = arith.divf %397, %398 : vector<4x32xf32>
    %c0_182 = arith.constant 0 : index
    %c0_183 = arith.constant 0 : index
    %400 = vector.load %arg7[%c0_182, %c0_183] : memref<4x64xf32, #tpu.memory_space<vmem>>, vector<4x32xf32>
    %401 = arith.mulf %391, %400 : vector<4x32xf32>
    %402 = arith.mulf %385, %393 : vector<4x32xf32>
    %403 = arith.addf %401, %402 : vector<4x32xf32>
    %404 = math.tanh %403 : vector<4x32xf32>
    %405 = arith.mulf %399, %404 : vector<4x32xf32>
    %c0_184 = arith.constant 0 : index
    %c0_185 = arith.constant 0 : index
    %406 = vector.load %arg7[%c0_184, %c0_185] : memref<4x64xf32, #tpu.memory_space<vmem>>, vector<4x32xf32>
    tpu.vector_store %arg7[%c0_184, %c0_185], %403 {strides = array<i32>} : memref<4x64xf32, #tpu.memory_space<vmem>>, vector<4x32xf32>,
    %c0_186 = arith.constant 0 : index
    %c0_187 = arith.constant 0 : index
    %407 = vector.load %arg6[%c0_186, %c0_187] : memref<4x64xf32, #tpu.memory_space<vmem>>, vector<4x32xf32>
    tpu.vector_store %arg6[%c0_186, %c0_187], %405 {strides = array<i32>} : memref<4x64xf32, #tpu.memory_space<vmem>>, vector<4x32xf32>,
    %c5_188 = arith.constant 5 : index
    %c0_189 = arith.constant 0 : index
    %c0_190 = arith.constant 0 : index
    %408 = vector.load %arg4[%c5_188, %c0_189, %c0_190] : memref<8x4x64xf32, #tpu.memory_space<vmem>>, vector<1x4x32xf32>
    %409 = vector.shape_cast %408 : vector<1x4x32xf32> to vector<4x32xf32>
    %410 = vector.shape_cast %405 : vector<4x32xf32> to vector<1x4x32xf32>
    tpu.vector_store %arg4[%c5_188, %c0_189, %c0_190], %410 {strides = array<i32>} : memref<8x4x64xf32, #tpu.memory_space<vmem>>, vector<1x4x32xf32>,
    %c2_191 = arith.constant 2 : index
    %c0_192 = arith.constant 0 : index
    %c128_193 = arith.constant 128 : index
    %411 = vector.load %arg5[%c2_191, %c0_192, %c128_193] : memref<8x4x256xf32, #tpu.memory_space<vmem>>, vector<1x4x128xf32>
    %412 = vector.shape_cast %411 : vector<1x4x128xf32> to vector<4x128xf32>
    %413 = vector.extract_strided_slice %375 {offsets = [0, 128], sizes = [4, 128], strides = [1, 1]} : vector<4x256xf32> to vector<4x128xf32>
    %414 = arith.addf %412, %413 : vector<4x128xf32>
    %415 = vector.extract_strided_slice %414 {offsets = [0, 0], sizes = [4, 32], strides = [1, 1]} : vector<4x128xf32> to vector<4x32xf32>
    %416 = arith.negf %415 : vector<4x32xf32>
    %417 = math.exp %416 : vector<4x32xf32>
    %cst_194 = arith.constant 1.000000e+00 : f32
    %418 = vector.broadcast %cst_194 : f32 to vector<4x32xf32>
    %419 = arith.addf %418, %417 : vector<4x32xf32>
    %420 = arith.divf %418, %419 : vector<4x32xf32>
    %421 = vector.extract_strided_slice %414 {offsets = [0, 32], sizes = [4, 32], strides = [1, 1]} : vector<4x128xf32> to vector<4x32xf32>
    %422 = arith.negf %421 : vector<4x32xf32>
    %423 = math.exp %422 : vector<4x32xf32>
    %cst_195 = arith.constant 1.000000e+00 : f32
    %424 = vector.broadcast %cst_195 : f32 to vector<4x32xf32>
    %425 = arith.addf %424, %423 : vector<4x32xf32>
    %426 = arith.divf %424, %425 : vector<4x32xf32>
    %427 = vector.extract_strided_slice %414 {offsets = [0, 64], sizes = [4, 32], strides = [1, 1]} : vector<4x128xf32> to vector<4x32xf32>
    %428 = math.tanh %427 : vector<4x32xf32>
    %429 = vector.extract_strided_slice %414 {offsets = [0, 96], sizes = [4, 32], strides = [1, 1]} : vector<4x128xf32> to vector<4x32xf32>
    %430 = arith.negf %429 : vector<4x32xf32>
    %431 = math.exp %430 : vector<4x32xf32>
    %cst_196 = arith.constant 1.000000e+00 : f32
    %432 = vector.broadcast %cst_196 : f32 to vector<4x32xf32>
    %433 = arith.addf %432, %431 : vector<4x32xf32>
    %434 = arith.divf %432, %433 : vector<4x32xf32>
    %c0_197 = arith.constant 0 : index
    %c32_198 = arith.constant 32 : index
    %435 = vector.load %arg7[%c0_197, %c32_198] : memref<4x64xf32, #tpu.memory_space<vmem>>, vector<4x32xf32>
    %436 = arith.mulf %426, %435 : vector<4x32xf32>
    %437 = arith.mulf %420, %428 : vector<4x32xf32>
    %438 = arith.addf %436, %437 : vector<4x32xf32>
    %439 = math.tanh %438 : vector<4x32xf32>
    %440 = arith.mulf %434, %439 : vector<4x32xf32>
    %c0_199 = arith.constant 0 : index
    %c32_200 = arith.constant 32 : index
    %441 = vector.load %arg7[%c0_199, %c32_200] : memref<4x64xf32, #tpu.memory_space<vmem>>, vector<4x32xf32>
    tpu.vector_store %arg7[%c0_199, %c32_200], %438 {strides = array<i32>} : memref<4x64xf32, #tpu.memory_space<vmem>>, vector<4x32xf32>,
    %c0_201 = arith.constant 0 : index
    %c32_202 = arith.constant 32 : index
    %442 = vector.load %arg6[%c0_201, %c32_202] : memref<4x64xf32, #tpu.memory_space<vmem>>, vector<4x32xf32>
    tpu.vector_store %arg6[%c0_201, %c32_202], %440 {strides = array<i32>} : memref<4x64xf32, #tpu.memory_space<vmem>>, vector<4x32xf32>,
    %c2_203 = arith.constant 2 : index
    %c0_204 = arith.constant 0 : index
    %c32_205 = arith.constant 32 : index
    %443 = vector.load %arg4[%c2_203, %c0_204, %c32_205] : memref<8x4x64xf32, #tpu.memory_space<vmem>>, vector<1x4x32xf32>
    %444 = vector.shape_cast %443 : vector<1x4x32xf32> to vector<4x32xf32>
    %445 = vector.shape_cast %440 : vector<4x32xf32> to vector<1x4x32xf32>
    tpu.vector_store %arg4[%c2_203, %c0_204, %c32_205], %445 {strides = array<i32>} : memref<8x4x64xf32, #tpu.memory_space<vmem>>, vector<1x4x32xf32>,
    %c0_206 = arith.constant 0 : index
    %c0_207 = arith.constant 0 : index
    %446 = vector.load %arg6[%c0_206, %c0_207] : memref<4x64xf32, #tpu.memory_space<vmem>>, vector<4x64xf32>
    %cst_208 = arith.constant dense<0.000000e+00> : vector<4x256xf32>
    %447 = tpu.matmul %446, %13, %cst_208 {dimension_numbers = #tpu.dot_dimension_numbers<[1], [0], [0], [1], [0, 0, 1, 1], [], []>} : vector<4x64xf32>, vector<64x256xf32>, vector<4x256xf32> -> vector<4x256xf32>
    %c6_209 = arith.constant 6 : index
    %c0_210 = arith.constant 0 : index
    %c0_211 = arith.constant 0 : index
    %448 = vector.load %arg5[%c6_209, %c0_210, %c0_211] : memref<8x4x256xf32, #tpu.memory_space<vmem>>, vector<1x4x128xf32>
    %449 = vector.shape_cast %448 : vector<1x4x128xf32> to vector<4x128xf32>
    %450 = vector.extract_strided_slice %447 {offsets = [0, 0], sizes = [4, 128], strides = [1, 1]} : vector<4x256xf32> to vector<4x128xf32>
    %451 = arith.addf %449, %450 : vector<4x128xf32>
    %452 = vector.extract_strided_slice %451 {offsets = [0, 0], sizes = [4, 32], strides = [1, 1]} : vector<4x128xf32> to vector<4x32xf32>
    %453 = arith.negf %452 : vector<4x32xf32>
    %454 = math.exp %453 : vector<4x32xf32>
    %cst_212 = arith.constant 1.000000e+00 : f32
    %455 = vector.broadcast %cst_212 : f32 to vector<4x32xf32>
    %456 = arith.addf %455, %454 : vector<4x32xf32>
    %457 = arith.divf %455, %456 : vector<4x32xf32>
    %458 = vector.extract_strided_slice %451 {offsets = [0, 32], sizes = [4, 32], strides = [1, 1]} : vector<4x128xf32> to vector<4x32xf32>
    %459 = arith.negf %458 : vector<4x32xf32>
    %460 = math.exp %459 : vector<4x32xf32>
    %cst_213 = arith.constant 1.000000e+00 : f32
    %461 = vector.broadcast %cst_213 : f32 to vector<4x32xf32>
    %462 = arith.addf %461, %460 : vector<4x32xf32>
    %463 = arith.divf %461, %462 : vector<4x32xf32>
    %464 = vector.extract_strided_slice %451 {offsets = [0, 64], sizes = [4, 32], strides = [1, 1]} : vector<4x128xf32> to vector<4x32xf32>
    %465 = math.tanh %464 : vector<4x32xf32>
    %466 = vector.extract_strided_slice %451 {offsets = [0, 96], sizes = [4, 32], strides = [1, 1]} : vector<4x128xf32> to vector<4x32xf32>
    %467 = arith.negf %466 : vector<4x32xf32>
    %468 = math.exp %467 : vector<4x32xf32>
    %cst_214 = arith.constant 1.000000e+00 : f32
    %469 = vector.broadcast %cst_214 : f32 to vector<4x32xf32>
    %470 = arith.addf %469, %468 : vector<4x32xf32>
    %471 = arith.divf %469, %470 : vector<4x32xf32>
    %c0_215 = arith.constant 0 : index
    %c0_216 = arith.constant 0 : index
    %472 = vector.load %arg7[%c0_215, %c0_216] : memref<4x64xf32, #tpu.memory_space<vmem>>, vector<4x32xf32>
    %473 = arith.mulf %463, %472 : vector<4x32xf32>
    %474 = arith.mulf %457, %465 : vector<4x32xf32>
    %475 = arith.addf %473, %474 : vector<4x32xf32>
    %476 = math.tanh %475 : vector<4x32xf32>
    %477 = arith.mulf %471, %476 : vector<4x32xf32>
    %c0_217 = arith.constant 0 : index
    %c0_218 = arith.constant 0 : index
    %478 = vector.load %arg7[%c0_217, %c0_218] : memref<4x64xf32, #tpu.memory_space<vmem>>, vector<4x32xf32>
    tpu.vector_store %arg7[%c0_217, %c0_218], %475 {strides = array<i32>} : memref<4x64xf32, #tpu.memory_space<vmem>>, vector<4x32xf32>,
    %c0_219 = arith.constant 0 : index
    %c0_220 = arith.constant 0 : index
    %479 = vector.load %arg6[%c0_219, %c0_220] : memref<4x64xf32, #tpu.memory_space<vmem>>, vector<4x32xf32>
    tpu.vector_store %arg6[%c0_219, %c0_220], %477 {strides = array<i32>} : memref<4x64xf32, #tpu.memory_space<vmem>>, vector<4x32xf32>,
    %c6_221 = arith.constant 6 : index
    %c0_222 = arith.constant 0 : index
    %c0_223 = arith.constant 0 : index
    %480 = vector.load %arg4[%c6_221, %c0_222, %c0_223] : memref<8x4x64xf32, #tpu.memory_space<vmem>>, vector<1x4x32xf32>
    %481 = vector.shape_cast %480 : vector<1x4x32xf32> to vector<4x32xf32>
    %482 = vector.shape_cast %477 : vector<4x32xf32> to vector<1x4x32xf32>
    tpu.vector_store %arg4[%c6_221, %c0_222, %c0_223], %482 {strides = array<i32>} : memref<8x4x64xf32, #tpu.memory_space<vmem>>, vector<1x4x32xf32>,
    %c1_224 = arith.constant 1 : index
    %c0_225 = arith.constant 0 : index
    %c128_226 = arith.constant 128 : index
    %483 = vector.load %arg5[%c1_224, %c0_225, %c128_226] : memref<8x4x256xf32, #tpu.memory_space<vmem>>, vector<1x4x128xf32>
    %484 = vector.shape_cast %483 : vector<1x4x128xf32> to vector<4x128xf32>
    %485 = vector.extract_strided_slice %447 {offsets = [0, 128], sizes = [4, 128], strides = [1, 1]} : vector<4x256xf32> to vector<4x128xf32>
    %486 = arith.addf %484, %485 : vector<4x128xf32>
    %487 = vector.extract_strided_slice %486 {offsets = [0, 0], sizes = [4, 32], strides = [1, 1]} : vector<4x128xf32> to vector<4x32xf32>
    %488 = arith.negf %487 : vector<4x32xf32>
    %489 = math.exp %488 : vector<4x32xf32>
    %cst_227 = arith.constant 1.000000e+00 : f32
    %490 = vector.broadcast %cst_227 : f32 to vector<4x32xf32>
    %491 = arith.addf %490, %489 : vector<4x32xf32>
    %492 = arith.divf %490, %491 : vector<4x32xf32>
    %493 = vector.extract_strided_slice %486 {offsets = [0, 32], sizes = [4, 32], strides = [1, 1]} : vector<4x128xf32> to vector<4x32xf32>
    %494 = arith.negf %493 : vector<4x32xf32>
    %495 = math.exp %494 : vector<4x32xf32>
    %cst_228 = arith.constant 1.000000e+00 : f32
    %496 = vector.broadcast %cst_228 : f32 to vector<4x32xf32>
    %497 = arith.addf %496, %495 : vector<4x32xf32>
    %498 = arith.divf %496, %497 : vector<4x32xf32>
    %499 = vector.extract_strided_slice %486 {offsets = [0, 64], sizes = [4, 32], strides = [1, 1]} : vector<4x128xf32> to vector<4x32xf32>
    %500 = math.tanh %499 : vector<4x32xf32>
    %501 = vector.extract_strided_slice %486 {offsets = [0, 96], sizes = [4, 32], strides = [1, 1]} : vector<4x128xf32> to vector<4x32xf32>
    %502 = arith.negf %501 : vector<4x32xf32>
    %503 = math.exp %502 : vector<4x32xf32>
    %cst_229 = arith.constant 1.000000e+00 : f32
    %504 = vector.broadcast %cst_229 : f32 to vector<4x32xf32>
    %505 = arith.addf %504, %503 : vector<4x32xf32>
    %506 = arith.divf %504, %505 : vector<4x32xf32>
    %c0_230 = arith.constant 0 : index
    %c32_231 = arith.constant 32 : index
    %507 = vector.load %arg7[%c0_230, %c32_231] : memref<4x64xf32, #tpu.memory_space<vmem>>, vector<4x32xf32>
    %508 = arith.mulf %498, %507 : vector<4x32xf32>
    %509 = arith.mulf %492, %500 : vector<4x32xf32>
    %510 = arith.addf %508, %509 : vector<4x32xf32>
    %511 = math.tanh %510 : vector<4x32xf32>
    %512 = arith.mulf %506, %511 : vector<4x32xf32>
    %c0_232 = arith.constant 0 : index
    %c32_233 = arith.constant 32 : index
    %513 = vector.load %arg7[%c0_232, %c32_233] : memref<4x64xf32, #tpu.memory_space<vmem>>, vector<4x32xf32>
    tpu.vector_store %arg7[%c0_232, %c32_233], %510 {strides = array<i32>} : memref<4x64xf32, #tpu.memory_space<vmem>>, vector<4x32xf32>,
    %c0_234 = arith.constant 0 : index
    %c32_235 = arith.constant 32 : index
    %514 = vector.load %arg6[%c0_234, %c32_235] : memref<4x64xf32, #tpu.memory_space<vmem>>, vector<4x32xf32>
    tpu.vector_store %arg6[%c0_234, %c32_235], %512 {strides = array<i32>} : memref<4x64xf32, #tpu.memory_space<vmem>>, vector<4x32xf32>,
    %c1_236 = arith.constant 1 : index
    %c0_237 = arith.constant 0 : index
    %c32_238 = arith.constant 32 : index
    %515 = vector.load %arg4[%c1_236, %c0_237, %c32_238] : memref<8x4x64xf32, #tpu.memory_space<vmem>>, vector<1x4x32xf32>
    %516 = vector.shape_cast %515 : vector<1x4x32xf32> to vector<4x32xf32>
    %517 = vector.shape_cast %512 : vector<4x32xf32> to vector<1x4x32xf32>
    tpu.vector_store %arg4[%c1_236, %c0_237, %c32_238], %517 {strides = array<i32>} : memref<8x4x64xf32, #tpu.memory_space<vmem>>, vector<1x4x32xf32>,
    %c0_239 = arith.constant 0 : index
    %c0_240 = arith.constant 0 : index
    %518 = vector.load %arg6[%c0_239, %c0_240] : memref<4x64xf32, #tpu.memory_space<vmem>>, vector<4x64xf32>
    %cst_241 = arith.constant dense<0.000000e+00> : vector<4x256xf32>
    %519 = tpu.matmul %518, %13, %cst_241 {dimension_numbers = #tpu.dot_dimension_numbers<[1], [0], [0], [1], [0, 0, 1, 1], [], []>} : vector<4x64xf32>, vector<64x256xf32>, vector<4x256xf32> -> vector<4x256xf32>
    %c7_242 = arith.constant 7 : index
    %c0_243 = arith.constant 0 : index
    %c0_244 = arith.constant 0 : index
    %520 = vector.load %arg5[%c7_242, %c0_243, %c0_244] : memref<8x4x256xf32, #tpu.memory_space<vmem>>, vector<1x4x128xf32>
    %521 = vector.shape_cast %520 : vector<1x4x128xf32> to vector<4x128xf32>
    %522 = vector.extract_strided_slice %519 {offsets = [0, 0], sizes = [4, 128], strides = [1, 1]} : vector<4x256xf32> to vector<4x128xf32>
    %523 = arith.addf %521, %522 : vector<4x128xf32>
    %524 = vector.extract_strided_slice %523 {offsets = [0, 0], sizes = [4, 32], strides = [1, 1]} : vector<4x128xf32> to vector<4x32xf32>
    %525 = arith.negf %524 : vector<4x32xf32>
    %526 = math.exp %525 : vector<4x32xf32>
    %cst_245 = arith.constant 1.000000e+00 : f32
    %527 = vector.broadcast %cst_245 : f32 to vector<4x32xf32>
    %528 = arith.addf %527, %526 : vector<4x32xf32>
    %529 = arith.divf %527, %528 : vector<4x32xf32>
    %530 = vector.extract_strided_slice %523 {offsets = [0, 32], sizes = [4, 32], strides = [1, 1]} : vector<4x128xf32> to vector<4x32xf32>
    %531 = arith.negf %530 : vector<4x32xf32>
    %532 = math.exp %531 : vector<4x32xf32>
    %cst_246 = arith.constant 1.000000e+00 : f32
    %533 = vector.broadcast %cst_246 : f32 to vector<4x32xf32>
    %534 = arith.addf %533, %532 : vector<4x32xf32>
    %535 = arith.divf %533, %534 : vector<4x32xf32>
    %536 = vector.extract_strided_slice %523 {offsets = [0, 64], sizes = [4, 32], strides = [1, 1]} : vector<4x128xf32> to vector<4x32xf32>
    %537 = math.tanh %536 : vector<4x32xf32>
    %538 = vector.extract_strided_slice %523 {offsets = [0, 96], sizes = [4, 32], strides = [1, 1]} : vector<4x128xf32> to vector<4x32xf32>
    %539 = arith.negf %538 : vector<4x32xf32>
    %540 = math.exp %539 : vector<4x32xf32>
    %cst_247 = arith.constant 1.000000e+00 : f32
    %541 = vector.broadcast %cst_247 : f32 to vector<4x32xf32>
    %542 = arith.addf %541, %540 : vector<4x32xf32>
    %543 = arith.divf %541, %542 : vector<4x32xf32>
    %c0_248 = arith.constant 0 : index
    %c0_249 = arith.constant 0 : index
    %544 = vector.load %arg7[%c0_248, %c0_249] : memref<4x64xf32, #tpu.memory_space<vmem>>, vector<4x32xf32>
    %545 = arith.mulf %535, %544 : vector<4x32xf32>
    %546 = arith.mulf %529, %537 : vector<4x32xf32>
    %547 = arith.addf %545, %546 : vector<4x32xf32>
    %548 = math.tanh %547 : vector<4x32xf32>
    %549 = arith.mulf %543, %548 : vector<4x32xf32>
    %c0_250 = arith.constant 0 : index
    %c0_251 = arith.constant 0 : index
    %550 = vector.load %arg7[%c0_250, %c0_251] : memref<4x64xf32, #tpu.memory_space<vmem>>, vector<4x32xf32>
    tpu.vector_store %arg7[%c0_250, %c0_251], %547 {strides = array<i32>} : memref<4x64xf32, #tpu.memory_space<vmem>>, vector<4x32xf32>,
    %c0_252 = arith.constant 0 : index
    %c0_253 = arith.constant 0 : index
    %551 = vector.load %arg6[%c0_252, %c0_253] : memref<4x64xf32, #tpu.memory_space<vmem>>, vector<4x32xf32>
    tpu.vector_store %arg6[%c0_252, %c0_253], %549 {strides = array<i32>} : memref<4x64xf32, #tpu.memory_space<vmem>>, vector<4x32xf32>,
    %c7_254 = arith.constant 7 : index
    %c0_255 = arith.constant 0 : index
    %c0_256 = arith.constant 0 : index
    %552 = vector.load %arg4[%c7_254, %c0_255, %c0_256] : memref<8x4x64xf32, #tpu.memory_space<vmem>>, vector<1x4x32xf32>
    %553 = vector.shape_cast %552 : vector<1x4x32xf32> to vector<4x32xf32>
    %554 = vector.shape_cast %549 : vector<4x32xf32> to vector<1x4x32xf32>
    tpu.vector_store %arg4[%c7_254, %c0_255, %c0_256], %554 {strides = array<i32>} : memref<8x4x64xf32, #tpu.memory_space<vmem>>, vector<1x4x32xf32>,
    %c0_257 = arith.constant 0 : index
    %c0_258 = arith.constant 0 : index
    %c128_259 = arith.constant 128 : index
    %555 = vector.load %arg5[%c0_257, %c0_258, %c128_259] : memref<8x4x256xf32, #tpu.memory_space<vmem>>, vector<1x4x128xf32>
    %556 = vector.shape_cast %555 : vector<1x4x128xf32> to vector<4x128xf32>
    %557 = vector.extract_strided_slice %519 {offsets = [0, 128], sizes = [4, 128], strides = [1, 1]} : vector<4x256xf32> to vector<4x128xf32>
    %558 = arith.addf %556, %557 : vector<4x128xf32>
    %559 = vector.extract_strided_slice %558 {offsets = [0, 0], sizes = [4, 32], strides = [1, 1]} : vector<4x128xf32> to vector<4x32xf32>
    %560 = arith.negf %559 : vector<4x32xf32>
    %561 = math.exp %560 : vector<4x32xf32>
    %cst_260 = arith.constant 1.000000e+00 : f32
    %562 = vector.broadcast %cst_260 : f32 to vector<4x32xf32>
    %563 = arith.addf %562, %561 : vector<4x32xf32>
    %564 = arith.divf %562, %563 : vector<4x32xf32>
    %565 = vector.extract_strided_slice %558 {offsets = [0, 32], sizes = [4, 32], strides = [1, 1]} : vector<4x128xf32> to vector<4x32xf32>
    %566 = arith.negf %565 : vector<4x32xf32>
    %567 = math.exp %566 : vector<4x32xf32>
    %cst_261 = arith.constant 1.000000e+00 : f32
    %568 = vector.broadcast %cst_261 : f32 to vector<4x32xf32>
    %569 = arith.addf %568, %567 : vector<4x32xf32>
    %570 = arith.divf %568, %569 : vector<4x32xf32>
    %571 = vector.extract_strided_slice %558 {offsets = [0, 64], sizes = [4, 32], strides = [1, 1]} : vector<4x128xf32> to vector<4x32xf32>
    %572 = math.tanh %571 : vector<4x32xf32>
    %573 = vector.extract_strided_slice %558 {offsets = [0, 96], sizes = [4, 32], strides = [1, 1]} : vector<4x128xf32> to vector<4x32xf32>
    %574 = arith.negf %573 : vector<4x32xf32>
    %575 = math.exp %574 : vector<4x32xf32>
    %cst_262 = arith.constant 1.000000e+00 : f32
    %576 = vector.broadcast %cst_262 : f32 to vector<4x32xf32>
    %577 = arith.addf %576, %575 : vector<4x32xf32>
    %578 = arith.divf %576, %577 : vector<4x32xf32>
    %c0_263 = arith.constant 0 : index
    %c32_264 = arith.constant 32 : index
    %579 = vector.load %arg7[%c0_263, %c32_264] : memref<4x64xf32, #tpu.memory_space<vmem>>, vector<4x32xf32>
    %580 = arith.mulf %570, %579 : vector<4x32xf32>
    %581 = arith.mulf %564, %572 : vector<4x32xf32>
    %582 = arith.addf %580, %581 : vector<4x32xf32>
    %583 = math.tanh %582 : vector<4x32xf32>
    %584 = arith.mulf %578, %583 : vector<4x32xf32>
    %c0_265 = arith.constant 0 : index
    %c32_266 = arith.constant 32 : index
    %585 = vector.load %arg7[%c0_265, %c32_266] : memref<4x64xf32, #tpu.memory_space<vmem>>, vector<4x32xf32>
    tpu.vector_store %arg7[%c0_265, %c32_266], %582 {strides = array<i32>} : memref<4x64xf32, #tpu.memory_space<vmem>>, vector<4x32xf32>,
    %c0_267 = arith.constant 0 : index
    %c32_268 = arith.constant 32 : index
    %586 = vector.load %arg6[%c0_267, %c32_268] : memref<4x64xf32, #tpu.memory_space<vmem>>, vector<4x32xf32>
    tpu.vector_store %arg6[%c0_267, %c32_268], %584 {strides = array<i32>} : memref<4x64xf32, #tpu.memory_space<vmem>>, vector<4x32xf32>,
    %c0_269 = arith.constant 0 : index
    %c0_270 = arith.constant 0 : index
    %c32_271 = arith.constant 32 : index
    %587 = vector.load %arg4[%c0_269, %c0_270, %c32_271] : memref<8x4x64xf32, #tpu.memory_space<vmem>>, vector<1x4x32xf32>
    %588 = vector.shape_cast %587 : vector<1x4x32xf32> to vector<4x32xf32>
    %589 = vector.shape_cast %584 : vector<4x32xf32> to vector<1x4x32xf32>
    tpu.vector_store %arg4[%c0_269, %c0_270, %c32_271], %589 {strides = array<i32>} : memref<8x4x64xf32, #tpu.memory_space<vmem>>, vector<1x4x32xf32>,
    return
  }
}

</mosaic_0001>

<bundles_post_ra>
// kernel: tpu_custom_call.1
= control target key start
LH: loop header
LB: loop body
LE: loop exit
PB: predicated region body
PF: predicated region fallthrough
CT: control target
= control target key end

     0   :  { %9 = vsyncpa [#allocation6], 0  ;;  %s2217_s0 = inlined_call_operand.hbm [shape: f32[8,4,16], index: 0, kind: input, shape index: {}]   ;;  %s2218_s1 = inlined_call_operand.hbm [shape: f32[16,256], index: 1, kind: input, shape index: {}]   ;;  %s2219_s2 = inlined_call_operand.hbm [shape: f32[64,256], index: 2, kind: input, shape index: {}]   ;;  %s2220_s3 = inlined_call_operand.vmem [shape: f32[1,256], index: 3, kind: input, shape index: {}]   ;;  %s2221_s4 = inlined_call_operand.hbm [shape: f32[8,4,64], index: 4, kind: output, shape index: {}]  }
   0x1   :  { %10 = vsyncpa [#allocation9], 0 }
   0x2   :  { %11 = vsyncpa [#allocation7], 0  ;;  %s1884_s15 = smov [#allocation8]   ;;  %s1790_s19 = scalar_lea.hbm %s2218_s1, 512 }
   0x3   :  { %s29_s16 = sshll.u32 %s1884_s15, 4  ;;  %p1791_p0 = scmp.ne.s32.totalorder %s2218_s1, %s1790_s19  ;;  %s30_s16 = int_to_ptr.vmem [resolvable:$true] %s29_s16 }
   0x4   :  { %p1794_p1 = scmp.lt.u32.totalorder %s1790_s19, %s2218_s1 }
   0x6   :  { %p1796_p2 = pnand %p1794_p1, %p1791_p0 }
   0x8   :  { %1799 = shalt.err (!%p1796_p2)
}
   0x9   :  { %s1800_s24 = scalar_lea.vmem %s30_s16, 512  ;;  %p1805_p4 = scmp.lt.s32.totalorder %s30_s16, %s30_s16 }
   0xa   :  { %p1801_p3 = scmp.ne.s32.totalorder %s30_s16, %s1800_s24  ;;  %p1806_p5 = scmp.lt.s32.totalorder %s1800_s24, %s1800_s24 }
   0xc   :  { %p1807_p6 = por %p1806_p5, %p1805_p4 }
   0xe   :  { %p1808_p7 = pnand %p1807_p6, %p1801_p3 }
  0x10   :  { %1811 = shalt.err (!%p1808_p7)
}
  0x11   :  { %s1885_s25 = smov 256   ;;  %s1886_s26 = smov 16  }
  0x12   :  { %35 = dma.hbm_to_vmem [thread:$0]  %s2218_s1, 512, %s30_s16, [#allocation9], %s1885_s25, %s1885_s25, %s1886_s26  }
  0x13   :  { %s1887_s29 = smov [#allocation5]   ;;  %s1812_s7 = scalar_lea.hbm %s2217_s0, 512 }
  0x14   :  { %s17_s30 = sshll.u32 %s1887_s29, 4  ;;  %p1813_p8 = scmp.ne.s32.totalorder %s2217_s0, %s1812_s7  ;;  %s18_s30 = int_to_ptr.vmem [resolvable:$true] %s17_s30 }
  0x15   :  { %p1816_p9 = scmp.lt.u32.totalorder %s1812_s7, %s2217_s0 }
  0x17   :  { %p1818_p10 = pnand %p1816_p9, %p1813_p8 }
  0x19   :  { %1821 = shalt.err (!%p1818_p10)
}
  0x1a   :  { %s1822_s12 = scalar_lea.vmem %s18_s30, 512  ;;  %p1827_p12 = scmp.lt.s32.totalorder %s18_s30, %s18_s30 }
  0x1b   :  { %p1823_p11 = scmp.ne.s32.totalorder %s18_s30, %s1822_s12  ;;  %p1828_p13 = scmp.lt.s32.totalorder %s1822_s12, %s1822_s12 }
  0x1d   :  { %p1829_p0 = por %p1828_p13, %p1827_p12 }
  0x1f   :  { %p1830_p1 = pnand %p1829_p0, %p1823_p11 }
  0x21   :  { %1833 = shalt.err (!%p1830_p1)
}
  0x22   :  { %s1888_s1 = smov 64   ;;  %s1889_s13 = smov 4  }
  0x23   :  { %23 = dma.hbm_to_vmem [thread:$0]  %s2217_s0, 512, %s18_s30, [#allocation6], %s1888_s1, %s1888_s1, %s1889_s13  }
  0x24   :  { %s1890_s16 = smov [#allocation10]   ;;  %s1834_s20 = scalar_lea.hbm %s2219_s2, 2048 }
  0x25   :  { %s41_s17 = sshll.u32 %s1890_s16, 4  ;;  %p1835_p2 = scmp.ne.s32.totalorder %s2219_s2, %s1834_s20  ;;  %s42_s17 = int_to_ptr.vmem [resolvable:$true] %s41_s17 }
  0x26   :  { %p1838_p3 = scmp.lt.u32.totalorder %s1834_s20, %s2219_s2 }
  0x28   :  { %p1840_p4 = pnand %p1838_p3, %p1835_p2 }
  0x2a   :  { %1843 = shalt.err (!%p1840_p4)
}
  0x2b   :  { %s1844_s27 = scalar_lea.vmem %s42_s17, 2048  ;;  %p1849_p6 = scmp.lt.s32.totalorder %s42_s17, %s42_s17 }
  0x2c   :  { %p1845_p5 = scmp.ne.s32.totalorder %s42_s17, %s1844_s27  ;;  %p1850_p7 = scmp.lt.s32.totalorder %s1844_s27, %s1844_s27 }
  0x2e   :  { %p1851_p8 = por %p1850_p7, %p1849_p6 }
  0x30   :  { %p1852_p9 = pnand %p1851_p8, %p1845_p5 }
  0x32   :  { %1855 = shalt.err (!%p1852_p9)
}
  0x33   :  { %47 = dma.hbm_to_vmem [thread:$0]  %s2219_s2, 2048, %s42_s17, [#allocation9], %s1885_s25, %s1885_s25, %s1886_s26  }
  0x34   :  { %1878 = dma.done.wait [#allocation6], 512  }
  0x35   :  { %1879 = vsyncadd [#allocation6], 4294966784 }
  0x36   :  { %1880 = dma.done.wait [#allocation9], 2560  }
  0x37   :  { %1881 = vsyncadd [#allocation9], 4294964736  ;;  %vm225_vm0 = vcmask 519168   ;;  %v1891_v0 = vmov 0.0   ;;  %v68_v1 = vld [vmem:[#allocation8 + $0x8] sm:$0xff]  ;;  %v70_v2 = vld [vmem:[#allocation8 + $0x18] sm:$0xff]  ;;  %v73_v36 = vlaneseq }
  0x38   :  { %168 = vmatprep.mubr.f32.mxu0 %v1891_v0  ;;  %226 = vst.msk [vmem:[#allocation3] sm:$0xf] %vm225_vm0, %v1891_v0  ;;  %227 = vst.msk [vmem:[#allocation4] sm:$0xf] %vm225_vm0, %v1891_v0  ;;  %313 = vmatprep.mubr.f32.mxu1 %v1891_v0  ;;  %v229_v3 = vld [vmem:[#allocation10 + $0x8] sm:$0xff]  ;;  %v1515_v4 = vpack.c.bf16 %v70_v2, %v68_v1  ;;  %v231_v5 = vld [vmem:[#allocation10 + $0x18] sm:$0xff] }
  0x39   :  { %v67_v6 = vld [vmem:[#allocation8] sm:$0xff]  ;;  %v69_v7 = vld [vmem:[#allocation8 + $0x10] sm:$0xff]  ;;  %v1969_v8 = vpack.c.bf16 %v231_v5, %v229_v3  ;;  %v233_v14 = vld [vmem:[#allocation10 + $0x28] sm:$0xff]  ;;  %vm95_vm1 = vcmask 130048   ;;  %vm245_vm2 = vcmask 523264   ;;  %v74_v37 = vshrl.u32 %v73_v36, 7 }
  0x3a   :  { %v1517_v9 = vpack.c.bf16 %v69_v7, %v67_v6  ;;  %v228_v10 = vld [vmem:[#allocation10] sm:$0xff]  ;;  %v230_v11 = vld [vmem:[#allocation10 + $0x10] sm:$0xff]  ;;  %1516 = vmatprep.subr.bf16.mxu0 %v1515_v4  ;;  %v235_v15 = vld [vmem:[#allocation10 + $0x38] sm:$0xff]  ;;  %s1893_s26 = smov 96   ;;  %vm355_vm3 = vcmask 257024   ;;  %vm391_vm4 = vcmask 519424  }
  0x3b   :  { %v1971_v12 = vpack.c.bf16 %v230_v11, %v228_v10  ;;  %v1658_v13 = vld [vmem:[#allocation5] sm:$0xff]   ;;  %1520 = vmatprep.subr.bf16.mxu1 %v1969_v8  ;;  %v234_v17 = vld [vmem:[#allocation10 + $0x30] sm:$0xff]  ;;  %v1975_v18 = vpack.c.bf16 %v235_v15, %v233_v14  ;;  %v1659_v20 = vld [vmem:[#allocation5 + $0x8] sm:$0xff]   ;;  %v75_v38 = vsub.s32 0, %v74_v37  ;;  %v79_v40 = vsub.s32 1, %v74_v37  ;;  %s1894_s29 = smov [#allocation11]  }
  0x3c   :  { %1518 = vmatpush1.bf16.msra.mxu0 %v1517_v9  ;;  %v232_v16 = vld [vmem:[#allocation10 + $0x20] sm:$0xff]  ;;  %v237_v21 = vld [vmem:[#allocation10 + $0x48] sm:$0xff]  ;;  %v239_v22 = vld [vmem:[#allocation10 + $0x58] sm:$0xff]  ;;  %s1474_s30 = sshll.u32 %s1894_s29, 4  ;;  %s1475_s30 = int_to_ptr.vmem [resolvable:$true] %s1474_s30 }
  0x3d   :  { %1522 = vmatpush1.bf16.msra.mxu1 %v1971_v12  ;;  %v1977_v19 = vpack.c.bf16 %v234_v17, %v232_v16  ;;  %1536 = vmatprep.subr.bf16.mxu0 %v1969_v8  ;;  %v236_v23 = vld [vmem:[#allocation10 + $0x40] sm:$0xff]  ;;  %v1982_v24 = vpack.c.bf16 %v239_v22, %v237_v21  ;;  %v238_v25 = vld [vmem:[#allocation10 + $0x50] sm:$0xff]  ;;  %v241_v26 = vld [vmem:[#allocation10 + $0x68] sm:$0xff]  ;;  %s1856_s5 = scalar_lea.vmem %s1475_s30, 512  ;;  %p1861_p11 = scmp.lt.s32.totalorder %s1475_s30, %s1475_s30 }
  0x3e   :  { %1524 = vmatprep.subr.bf16.mxu1 %v1975_v18  ;;  %v243_v27 = vld [vmem:[#allocation10 + $0x78] sm:$0xff]  ;;  %v1987_v28 = vpack.c.bf16 %v238_v25, %v236_v23  ;;  %v240_v30 = vld [vmem:[#allocation10 + $0x60] sm:$0xff]  ;;  %v242_v31 = vld [vmem:[#allocation10 + $0x70] sm:$0xff]  ;;  %p1857_p10 = scmp.ne.s32.totalorder %s1475_s30, %s1856_s5  ;;  %p1862_p12 = scmp.lt.s32.totalorder %s1856_s5, %s1856_s5 }
  0x3f   :  { %1487 = vmatmul.mubr.msk.f32.vlgmr.msra.gmra.mrb[0].mxu0 %vm95_vm1, %v1658_v13  ;;  %v1991_v29 = vpack.c.bf16 %v243_v27, %v241_v26  ;;  %v1660_v32 = vld [vmem:[#allocation5 + $0x10] sm:$0xff]   ;;  %v1997_v33 = vpack.c.bf16 %v242_v31, %v240_v30  ;;  %v1661_v34 = vld [vmem:[#allocation5 + $0x18] sm:$0xff]  }
  0x40   :  { %174 = vmatprep.mubr.f32.mxu0 %v1891_v0  ;;  %1538 = vmatpush1.bf16.msra.mxu0 %v1971_v12  ;;  %v244_v35 = vld [vmem:[#allocation3] sm:$0xf]  ;;  %v329_v10 = vld [vmem:[#allocation4] sm:$0xf]  ;;  %p1863_p13 = por %p1862_p12, %p1861_p11 }
  0x41   :  { %1526 = vmatpush1.bf16.msra.mxu1 %v1977_v19  ;;  %1540 = vmatprep.subr.bf16.mxu0 %v1975_v18  ;;  %v71_v39 = vld [vmem:[%s2220_s3] sm:$0x3]  ;;  %s1892_s3 = smov 32  }
  0x42   :  { %1528 = vmatprep.subr.bf16.mxu1 %v1982_v24  ;;  %v76_v41 = vrot.slane %v71_v39, %v75_v38  ;;  %v80_v42 = vrot.slane %v71_v39, %v79_v40  ;;  %p1864_p0 = pnand %p1863_p13, %p1857_p10 }
  0x43   :  { %1488 = vmatmul.mubr.msk.f32.gmra.mrb[2].mxu0 %vm95_vm1, %v1659_v20 }
  0x44   :  { %180 = vmatprep.mubr.f32.mxu0 %v1891_v0  ;;  %1542 = vmatpush1.bf16.msra.mxu0 %v1977_v19 }
  0x45   :  { %1530 = vmatpush1.bf16.msra.mxu1 %v1987_v28  ;;  %1544 = vmatprep.subr.bf16.mxu0 %v1982_v24 }
  0x46   :  { %1532 = vmatprep.subr.bf16.mxu1 %v1991_v29 }
  0x47   :  { %1489 = vmatmul.mubr.msk.f32.gmra.mrb[4].mxu0 %vm95_vm1, %v1660_v32 }
  0x48   :  { %186 = vmatprep.mubr.f32.mxu0 %v1891_v0  ;;  %1546 = vmatpush1.bf16.msra.mxu0 %v1987_v28 }
  0x49   :  { %1534 = vmatpush1.bf16.msra.mxu1 %v1997_v33  ;;  %1548 = vmatprep.subr.bf16.mxu0 %v1991_v29 }
  0x4a   :  { %1552 = vmatprep.subr.bf16.mxu1 %v1969_v8 }
  0x4b   :  { %1490 = vmatmul.mubr.msk.f32.gmra.mrb[6].mxu0 %vm95_vm1, %v1661_v34 }
  0x4c   :  { %1491 = vmatmul.mubr.msk.f32.vlgmr.msra.gmra.mrb[0].mxu1 %vm245_vm2, %v244_v35  ;;  %1550 = vmatpush1.bf16.msra.mxu0 %v1997_v33 }
  0x4d   :  { %468 = vmatprep.mubr.f32.mxu0 %v1891_v0  ;;  %1554 = vmatpush1.bf16.msra.mxu1 %v1971_v12 }
  0x4e   :  { %1556 = vmatprep.subr.bf16.mxu1 %v1975_v18  ;;  %623 = vmatprep.mubr.f32.mxu1 %v1891_v0 }
  0x4f   :  { %1568 = vmatprep.subr.bf16.mxu0 %v1969_v8 }
  0x51   :  { %1558 = vmatpush1.bf16.msra.mxu1 %v1977_v19 }
  0x52   :  { %1560 = vmatprep.subr.bf16.mxu1 %v1982_v24 }
  0x55   :  { %1562 = vmatpush1.bf16.msra.mxu1 %v1987_v28 }
  0x56   :  { %1564 = vmatprep.subr.bf16.mxu1 %v1991_v29 }
  0x59   :  { %1566 = vmatpush1.bf16.msra.mxu1 %v1997_v33 }
  0x5a   :  { %1584 = vmatprep.subr.bf16.mxu1 %v1969_v8 }
 0x112   :  { %v170_v43 = vpop.f32.mrb[0].mxu0 }
 0x113   :  { %v171_v44 = vadd.f32 %v170_v43, %v76_v41  ;;  %v172_v45 = vpop.f32.mrb[1].mxu0 }
 0x114   :  { %v173_v46 = vadd.f32 %v172_v45, %v80_v42 }
 0x116   :  { %v201_v47 = vcombine.low %v171_v44, %v173_v46  ;;  %v202_v48 = vcombine.high %v171_v44, %v173_v46  ;;  %v176_v49 = vpop.f32.mrb[2].mxu0 }
 0x117   :  { %v177_v50 = vadd.f32 %v176_v49, %v76_v41  ;;  %v178_v51 = vpop.f32.mrb[3].mxu0 }
 0x118   :  { %217 = vst [vmem:[#allocation2] sm:$0xff] %v201_v47  ;;  %218 = vst [vmem:[#allocation2 + $0x8] sm:$0xff] %v202_v48  ;;  %v179_v52 = vadd.f32 %v178_v51, %v80_v42 }
 0x11a   :  { %v203_v53 = vcombine.low %v177_v50, %v179_v52  ;;  %v204_v54 = vcombine.high %v177_v50, %v179_v52  ;;  %v182_v55 = vpop.f32.mrb[4].mxu0 }
 0x11b   :  { %v183_v56 = vadd.f32 %v182_v55, %v76_v41  ;;  %v184_v57 = vpop.f32.mrb[5].mxu0 }
 0x11c   :  { %219 = vst [vmem:[#allocation2 + $0x10] sm:$0xff] %v203_v53  ;;  %220 = vst [vmem:[#allocation2 + $0x18] sm:$0xff] %v204_v54  ;;  %v185_v58 = vadd.f32 %v184_v57, %v80_v42 }
 0x11e   :  { %v205_v59 = vcombine.low %v183_v56, %v185_v58  ;;  %v206_v60 = vcombine.high %v183_v56, %v185_v58  ;;  %v188_v61 = vpop.f32.mrb[6].mxu0 }
 0x11f   :  { %v189_v62 = vadd.f32 %v188_v61, %v76_v41  ;;  %v315_v63 = vpop.f32.mrb[0].mxu1  ;;  %v320_v1 = vld [vmem:[#allocation2] sm:$0xf]  ;;  %v190_v2 = vpop.f32.mrb[7].mxu0  ;;  %v476_v53 = vld [vmem:[#allocation2 + $0x8] sm:$0xf] }
 0x120   :  { %221 = vst [vmem:[#allocation2 + $0x20] sm:$0xff] %v205_v59  ;;  %222 = vst [vmem:[#allocation2 + $0x28] sm:$0xff] %v206_v60  ;;  %v321_v3 = vadd.f32 %v320_v1, %v315_v63  ;;  %v191_v4 = vadd.f32 %v190_v2, %v80_v42  ;;  %v317_v5 = vpop.f32.mrb[1].mxu1 }
 0x122   :  { %v207_v6 = vcombine.low %v189_v62, %v191_v4  ;;  %v208_v7 = vcombine.high %v189_v62, %v191_v4  ;;  %1662 = vtanh.f32 %v321_v3  ;;  %v1492_v11 = vmul.f32 -1.442695, %v321_v3 }
 0x124   :  { %223 = vst [vmem:[#allocation2 + $0x30] sm:$0xff] %v207_v6  ;;  %224 = vst [vmem:[#allocation2 + $0x38] sm:$0xff] %v208_v7  ;;  %1664 = vpow2.f32 %v1492_v11 }
 0x12b   :  { %v364_v15 = vld [vmem:[#allocation2 + $0x3c] sm:$0xf]  ;;  %v520_v56 = vld [vmem:[#allocation2 + $0x34] sm:$0xf] }
 0x12c   :  { %v1663_v9 = vpop.eup %1662  ;;  %v365_v16 = vadd.f32 %v364_v15, %v317_v5 }
 0x12d   :  { %336 = vrot.lane.b32.xlu0 %v1663_v9, %s1888_s1 }
 0x12e   :  { %v1665_v13 = vpop.eup %1664  ;;  %v1493_v23 = vmul.f32 -1.442695, %v365_v16 }
 0x12f   :  { %v325_v14 = vadd.f32 1.0, %v1665_v13 }
 0x131   :  { %331 = vrot.lane.b32.xlu0 %v329_v10, %s1892_s3  ;;  %1666 = vrcp.f32 %v325_v14 }
 0x132   :  { %1668 = vtanh.f32 %v365_v16 }
 0x133   :  { %1670 = vpow2.f32 %v1493_v23 }
 0x13b   :  { %v1667_v17 = vpop.eup %1666 }
 0x13c   :  { %v1669_v22 = vpop.eup %1668 }
 0x13d   :  { %v1671_v25 = vpop.eup %1670 }
 0x13e   :  { %v369_v26 = vadd.f32 1.0, %v1671_v25 }
 0x140   :  { %1672 = vrcp.f32 %v369_v26 }
 0x14a   :  { %v1673_v34 = vpop.eup %1672 }
 0x19f   :  { %v337_v20 = vpop.permute.xlu0 %336 }
 0x1a0   :  { %v339_v21 = vmul.f32 %v1667_v17, %v337_v20 }
 0x1a2   :  { %341 = vrot.lane.b32.xlu1 %v339_v21, %s1892_s3 }
 0x1a3   :  { %v332_v27 = vpop.permute.xlu0 %331 }
 0x1a4   :  { %v334_v30 = vmul.f32 %v1667_v17, %v332_v27 }
 0x1a6   :  { %376 = vrot.lane.b32.xlu1 %v1669_v22, %s1888_s1 }
 0x214   :  { %v342_v31 = vpop.permute.xlu1 %341 }
 0x215   :  { %v344_v32 = vadd.f32 %v342_v31, %v334_v30 }
 0x217   :  { %1674 = vtanh.f32 %v344_v32  ;;  %352 = vrot.lane.b32.xlu0 %v344_v32, %s1893_s26 }
 0x218   :  { %v377_v35 = vpop.permute.xlu1 %376 }
 0x219   :  { %v379_v36 = vmul.f32 %v1673_v34, %v377_v35 }
 0x21b   :  { %381 = vrot.lane.b32.xlu1 %v379_v36, %s1892_s3 }
 0x221   :  { %v1675_v37 = vpop.eup %1674 }
 0x222   :  { %347 = vrot.lane.b32.xlu0 %v1675_v37, %s1888_s1  ;;  %v631_v37 = vld [vmem:[#allocation2 + $0x10] sm:$0xf] }
 0x289   :  { %v353_v38 = vpop.permute.xlu0 %352 }
 0x28a   :  { %356 = vst.msk [vmem:[#allocation4] sm:$0xf] %vm355_vm3, %v353_v38 }
 0x28d   :  { %v382_v41 = vpop.permute.xlu1 %381 }
 0x291   :  { %v373_v39 = vld [vmem:[#allocation4] sm:$0xf] }
 0x292   :  { %v374_v40 = vmul.f32 %v1673_v34, %v373_v39 }
 0x294   :  { %v384_v42 = vadd.f32 %v382_v41, %v374_v40  ;;  %v348_v43 = vpop.permute.xlu0 %347  ;;  %v675_v40 = vld [vmem:[#allocation2 + $0x2c] sm:$0xf] }
 0x295   :  { %v350_v44 = vmul.f32 %v1667_v17, %v348_v43 }
 0x296   :  { %1676 = vtanh.f32 %v384_v42  ;;  %392 = vst.msk [vmem:[#allocation4] sm:$0xf] %vm391_vm4, %v384_v42 }
 0x297   :  { %358 = vrot.lane.b32.xlu0 %v350_v44, %s1892_s3 }
 0x29d   :  { %v485_v49 = vld [vmem:[#allocation4] sm:$0xf] }
 0x2a0   :  { %v1677_v45 = vpop.eup %1676 }
 0x2a1   :  { %387 = vrot.lane.b32.xlu1 %v1677_v45, %s1888_s1 }
 0x309   :  { %v359_v46 = vpop.permute.xlu0 %358 }
 0x30a   :  { %361 = vst.msk [vmem:[#allocation3] sm:$0xf] %vm355_vm3, %v359_v46  ;;  %362 = vst.msk [vmem:[#allocation11] sm:$0xf] %vm355_vm3, %v359_v46 }
 0x313   :  { %v388_v47 = vpop.permute.xlu1 %387 }
 0x314   :  { %v390_v48 = vmul.f32 %v1673_v34, %v388_v47 }
 0x316   :  { %394 = vrot.lane.b32.xlu1 %v390_v48, %s1888_s1 }
 0x31a   :  { %487 = vrot.lane.b32.xlu1 %v485_v49, %s1892_s3 }
 0x388   :  { %v395_v50 = vpop.permute.xlu1 %394 }
 0x389   :  { %397 = vst.msk [vmem:[#allocation3] sm:$0xf] %vm391_vm4, %v395_v50  ;;  %399 = vst.msk [vmem:[#allocation11 + $0x1c] sm:$0xf] %vm391_vm4, %v395_v50 }
 0x38c   :  { %v488_v3 = vpop.permute.xlu1 %487 }
 0x390   :  { %v400_v51 = vld [vmem:[#allocation3] sm:$0xf] }
 0x391   :  { %1494 = vmatmul.mubr.msk.f32.vlgmr.msra.gmra.mrb[8].mxu0 %vm245_vm2, %v400_v51 }
 0x392   :  { %1570 = vmatpush1.bf16.msra.mxu0 %v1971_v12  ;;  %778 = vmatprep.mubr.f32.mxu0 %v1891_v0 }
 0x393   :  { %1572 = vmatprep.subr.bf16.mxu0 %v1975_v18 }
 0x396   :  { %1574 = vmatpush1.bf16.msra.mxu0 %v1977_v19 }
 0x397   :  { %1576 = vmatprep.subr.bf16.mxu0 %v1982_v24 }
 0x39a   :  { %1578 = vmatpush1.bf16.msra.mxu0 %v1987_v28 }
 0x39b   :  { %1580 = vmatprep.subr.bf16.mxu0 %v1991_v29 }
 0x39e   :  { %1582 = vmatpush1.bf16.msra.mxu0 %v1997_v33 }
 0x39f   :  { %1600 = vmatprep.subr.bf16.mxu0 %v1969_v8 }
 0x464   :  { %v470_v52 = vpop.f32.mrb[8].mxu0 }
 0x465   :  { %v477_v54 = vadd.f32 %v476_v53, %v470_v52  ;;  %v472_v55 = vpop.f32.mrb[9].mxu0 }
 0x466   :  { %v521_v57 = vadd.f32 %v520_v56, %v472_v55 }
 0x467   :  { %1678 = vtanh.f32 %v477_v54  ;;  %v1495_v60 = vmul.f32 -1.442695, %v477_v54 }
 0x468   :  { %1680 = vtanh.f32 %v521_v57  ;;  %v1496_v61 = vmul.f32 -1.442695, %v521_v57 }
 0x469   :  { %1682 = vpow2.f32 %v1495_v60 }
 0x46a   :  { %1684 = vpow2.f32 %v1496_v61 }
 0x471   :  { %v1679_v58 = vpop.eup %1678 }
 0x472   :  { %v1681_v59 = vpop.eup %1680  ;;  %492 = vrot.lane.b32.xlu0 %v1679_v58, %s1888_s1 }
 0x473   :  { %532 = vrot.lane.b32.xlu1 %v1681_v59, %s1888_s1  ;;  %v1683_v62 = vpop.eup %1682 }
 0x474   :  { %v1685_v63 = vpop.eup %1684  ;;  %v481_v1 = vadd.f32 1.0, %v1683_v62 }
 0x475   :  { %v525_v2 = vadd.f32 1.0, %v1685_v63 }
 0x476   :  { %1686 = vrcp.f32 %v481_v1 }
 0x477   :  { %1688 = vrcp.f32 %v525_v2 }
 0x480   :  { %v1687_v4 = vpop.eup %1686 }
 0x481   :  { %v1689_v6 = vpop.eup %1688  ;;  %v490_v11 = vmul.f32 %v1687_v4, %v488_v3 }
 0x4e4   :  { %v493_v5 = vpop.permute.xlu0 %492 }
 0x4e5   :  { %v495_v7 = vmul.f32 %v1687_v4, %v493_v5  ;;  %v533_v9 = vpop.permute.xlu1 %532 }
 0x4e6   :  { %v535_v10 = vmul.f32 %v1689_v6, %v533_v9 }
 0x4e7   :  { %497 = vrot.lane.b32.xlu0 %v495_v7, %s1892_s3 }
 0x4e8   :  { %537 = vrot.lane.b32.xlu1 %v535_v10, %s1892_s3 }
 0x559   :  { %v498_v13 = vpop.permute.xlu0 %497 }
 0x55a   :  { %v500_v14 = vadd.f32 %v498_v13, %v490_v11  ;;  %v538_v21 = vpop.permute.xlu1 %537 }
 0x55c   :  { %1690 = vtanh.f32 %v500_v14  ;;  %508 = vrot.lane.b32.xlu0 %v500_v14, %s1893_s26 }
 0x566   :  { %v1691_v15 = vpop.eup %1690 }
 0x567   :  { %503 = vrot.lane.b32.xlu0 %v1691_v15, %s1888_s1  ;;  %v786_v15 = vld [vmem:[#allocation2 + $0x18] sm:$0xf] }
 0x5ce   :  { %v509_v16 = vpop.permute.xlu0 %508 }
 0x5cf   :  { %511 = vst.msk [vmem:[#allocation4] sm:$0xf] %vm355_vm3, %v509_v16 }
 0x5d6   :  { %v529_v17 = vld [vmem:[#allocation4] sm:$0xf] }
 0x5d7   :  { %v530_v20 = vmul.f32 %v1689_v6, %v529_v17 }
 0x5d9   :  { %v504_v22 = vpop.permute.xlu0 %503  ;;  %v540_v23 = vadd.f32 %v538_v21, %v530_v20  ;;  %v830_v20 = vld [vmem:[#allocation2 + $0x24] sm:$0xf] }
 0x5da   :  { %v506_v25 = vmul.f32 %v1687_v4, %v504_v22 }
 0x5db   :  { %1692 = vtanh.f32 %v540_v23  ;;  %547 = vst.msk [vmem:[#allocation4] sm:$0xf] %vm391_vm4, %v540_v23 }
 0x5dc   :  { %513 = vrot.lane.b32.xlu0 %v506_v25, %s1892_s3 }
 0x5e2   :  { %v640_v32 = vld [vmem:[#allocation4] sm:$0xf] }
 0x5e5   :  { %v1693_v26 = vpop.eup %1692 }
 0x5e6   :  { %543 = vrot.lane.b32.xlu1 %v1693_v26, %s1888_s1 }
 0x64e   :  { %v514_v27 = vpop.permute.xlu0 %513 }
 0x64f   :  { %516 = vst.msk [vmem:[#allocation3] sm:$0xf] %vm355_vm3, %v514_v27  ;;  %518 = vst.msk [vmem:[#allocation11 + $0x4] sm:$0xf] %vm355_vm3, %v514_v27 }
 0x658   :  { %v544_v30 = vpop.permute.xlu1 %543 }
 0x659   :  { %v546_v31 = vmul.f32 %v1689_v6, %v544_v30 }
 0x65b   :  { %549 = vrot.lane.b32.xlu1 %v546_v31, %s1888_s1 }
 0x65f   :  { %642 = vrot.lane.b32.xlu1 %v640_v32, %s1892_s3 }
 0x6cd   :  { %v550_v34 = vpop.permute.xlu1 %549 }
 0x6ce   :  { %552 = vst.msk [vmem:[#allocation3] sm:$0xf] %vm391_vm4, %v550_v34  ;;  %554 = vst.msk [vmem:[#allocation11 + $0x18] sm:$0xf] %vm391_vm4, %v550_v34 }
 0x6d1   :  { %v643_v50 = vpop.permute.xlu1 %642 }
 0x6d5   :  { %v555_v35 = vld [vmem:[#allocation3] sm:$0xf] }
 0x6d6   :  { %1497 = vmatmul.mubr.msk.f32.vlgmr.msra.gmra.mrb[2].mxu1 %vm245_vm2, %v555_v35 }
 0x6d7   :  { %1586 = vmatpush1.bf16.msra.mxu1 %v1971_v12  ;;  %933 = vmatprep.mubr.f32.mxu1 %v1891_v0 }
 0x6d8   :  { %1588 = vmatprep.subr.bf16.mxu1 %v1975_v18 }
 0x6db   :  { %1590 = vmatpush1.bf16.msra.mxu1 %v1977_v19 }
 0x6dc   :  { %1592 = vmatprep.subr.bf16.mxu1 %v1982_v24 }
 0x6df   :  { %1594 = vmatpush1.bf16.msra.mxu1 %v1987_v28 }
 0x6e0   :  { %1596 = vmatprep.subr.bf16.mxu1 %v1991_v29 }
 0x6e3   :  { %1598 = vmatpush1.bf16.msra.mxu1 %v1997_v33 }
 0x6e4   :  { %1616 = vmatprep.subr.bf16.mxu1 %v1969_v8 }
 0x7a9   :  { %v625_v36 = vpop.f32.mrb[2].mxu1 }
 0x7aa   :  { %v632_v38 = vadd.f32 %v631_v37, %v625_v36  ;;  %v627_v39 = vpop.f32.mrb[3].mxu1 }
 0x7ab   :  { %v676_v41 = vadd.f32 %v675_v40, %v627_v39 }
 0x7ac   :  { %1694 = vtanh.f32 %v632_v38  ;;  %v1498_v44 = vmul.f32 -1.442695, %v632_v38 }
 0x7ad   :  { %1696 = vtanh.f32 %v676_v41  ;;  %v1499_v45 = vmul.f32 -1.442695, %v676_v41 }
 0x7ae   :  { %1698 = vpow2.f32 %v1498_v44 }
 0x7af   :  { %1700 = vpow2.f32 %v1499_v45 }
 0x7b6   :  { %v1695_v42 = vpop.eup %1694 }
 0x7b7   :  { %v1697_v43 = vpop.eup %1696  ;;  %647 = vrot.lane.b32.xlu0 %v1695_v42, %s1888_s1 }
 0x7b8   :  { %687 = vrot.lane.b32.xlu1 %v1697_v43, %s1888_s1  ;;  %v1699_v46 = vpop.eup %1698 }
 0x7b9   :  { %v1701_v47 = vpop.eup %1700  ;;  %v636_v48 = vadd.f32 1.0, %v1699_v46 }
 0x7ba   :  { %v680_v49 = vadd.f32 1.0, %v1701_v47 }
 0x7bb   :  { %1702 = vrcp.f32 %v636_v48 }
 0x7bc   :  { %1704 = vrcp.f32 %v680_v49 }
 0x7c5   :  { %v1703_v51 = vpop.eup %1702 }
 0x7c6   :  { %v1705_v53 = vpop.eup %1704  ;;  %v645_v57 = vmul.f32 %v1703_v51, %v643_v50 }
 0x829   :  { %v648_v52 = vpop.permute.xlu0 %647 }
 0x82a   :  { %v650_v54 = vmul.f32 %v1703_v51, %v648_v52  ;;  %v688_v55 = vpop.permute.xlu1 %687 }
 0x82b   :  { %v690_v56 = vmul.f32 %v1705_v53, %v688_v55 }
 0x82c   :  { %652 = vrot.lane.b32.xlu0 %v650_v54, %s1892_s3 }
 0x82d   :  { %692 = vrot.lane.b32.xlu1 %v690_v56, %s1892_s3 }
 0x89e   :  { %v653_v58 = vpop.permute.xlu0 %652 }
 0x89f   :  { %v655_v59 = vadd.f32 %v653_v58, %v645_v57  ;;  %v693_v1 = vpop.permute.xlu1 %692 }
 0x8a1   :  { %1706 = vtanh.f32 %v655_v59  ;;  %663 = vrot.lane.b32.xlu0 %v655_v59, %s1893_s26  ;;  %v940_v59 = vld [vmem:[#allocation2 + $0x20] sm:$0xf] }
 0x8ab   :  { %v1707_v60 = vpop.eup %1706 }
 0x8ac   :  { %658 = vrot.lane.b32.xlu0 %v1707_v60, %s1888_s1 }
 0x913   :  { %v664_v61 = vpop.permute.xlu0 %663 }
 0x914   :  { %666 = vst.msk [vmem:[#allocation4] sm:$0xf] %vm355_vm3, %v664_v61 }
 0x91b   :  { %v684_v62 = vld [vmem:[#allocation4] sm:$0xf] }
 0x91c   :  { %v685_v63 = vmul.f32 %v1705_v53, %v684_v62  ;;  %v982_v62 = vld [vmem:[#allocation2 + $0x1c] sm:$0xf] }
 0x91e   :  { %v659_v2 = vpop.permute.xlu0 %658  ;;  %v695_v3 = vadd.f32 %v693_v1, %v685_v63 }
 0x91f   :  { %v661_v4 = vmul.f32 %v1703_v51, %v659_v2 }
 0x920   :  { %1708 = vtanh.f32 %v695_v3  ;;  %702 = vst.msk [vmem:[#allocation4] sm:$0xf] %vm391_vm4, %v695_v3 }
 0x921   :  { %668 = vrot.lane.b32.xlu0 %v661_v4, %s1892_s3 }
 0x927   :  { %v795_v10 = vld [vmem:[#allocation4] sm:$0xf] }
 0x92a   :  { %v1709_v5 = vpop.eup %1708 }
 0x92b   :  { %698 = vrot.lane.b32.xlu1 %v1709_v5, %s1888_s1 }
 0x993   :  { %v669_v6 = vpop.permute.xlu0 %668 }
 0x994   :  { %671 = vst.msk [vmem:[#allocation3] sm:$0xf] %vm355_vm3, %v669_v6  ;;  %673 = vst.msk [vmem:[#allocation11 + $0x8] sm:$0xf] %vm355_vm3, %v669_v6 }
 0x99d   :  { %v699_v7 = vpop.permute.xlu1 %698 }
 0x99e   :  { %v701_v9 = vmul.f32 %v1705_v53, %v699_v7 }
 0x9a0   :  { %704 = vrot.lane.b32.xlu1 %v701_v9, %s1888_s1 }
 0x9a4   :  { %797 = vrot.lane.b32.xlu1 %v795_v10, %s1892_s3 }
 0xa12   :  { %v705_v11 = vpop.permute.xlu1 %704 }
 0xa13   :  { %707 = vst.msk [vmem:[#allocation3] sm:$0xf] %vm391_vm4, %v705_v11  ;;  %709 = vst.msk [vmem:[#allocation11 + $0x14] sm:$0xf] %vm391_vm4, %v705_v11 }
 0xa16   :  { %v798_v32 = vpop.permute.xlu1 %797 }
 0xa1a   :  { %v710_v13 = vld [vmem:[#allocation3] sm:$0xf] }
 0xa1b   :  { %1500 = vmatmul.mubr.msk.f32.vlgmr.msra.gmra.mrb[10].mxu0 %vm245_vm2, %v710_v13 }
 0xa1c   :  { %1602 = vmatpush1.bf16.msra.mxu0 %v1971_v12  ;;  %1084 = vmatprep.mubr.f32.mxu0 %v1891_v0 }
 0xa1d   :  { %1604 = vmatprep.subr.bf16.mxu0 %v1975_v18 }
 0xa20   :  { %1606 = vmatpush1.bf16.msra.mxu0 %v1977_v19 }
 0xa21   :  { %1608 = vmatprep.subr.bf16.mxu0 %v1982_v24 }
 0xa24   :  { %1610 = vmatpush1.bf16.msra.mxu0 %v1987_v28 }
 0xa25   :  { %1612 = vmatprep.subr.bf16.mxu0 %v1991_v29 }
 0xa28   :  { %1614 = vmatpush1.bf16.msra.mxu0 %v1997_v33 }
 0xa29   :  { %1632 = vmatprep.subr.bf16.mxu0 %v1969_v8 }
 0xaee   :  { %v780_v14 = vpop.f32.mrb[10].mxu0 }
 0xaef   :  { %v787_v16 = vadd.f32 %v786_v15, %v780_v14  ;;  %v782_v17 = vpop.f32.mrb[11].mxu0 }
 0xaf0   :  { %v831_v21 = vadd.f32 %v830_v20, %v782_v17 }
 0xaf1   :  { %1710 = vtanh.f32 %v787_v16  ;;  %v1501_v25 = vmul.f32 -1.442695, %v787_v16 }
 0xaf2   :  { %1712 = vtanh.f32 %v831_v21  ;;  %v1502_v26 = vmul.f32 -1.442695, %v831_v21 }
 0xaf3   :  { %1714 = vpow2.f32 %v1501_v25 }
 0xaf4   :  { %1716 = vpow2.f32 %v1502_v26 }
 0xafb   :  { %v1711_v22 = vpop.eup %1710 }
 0xafc   :  { %v1713_v23 = vpop.eup %1712  ;;  %802 = vrot.lane.b32.xlu0 %v1711_v22, %s1888_s1 }
 0xafd   :  { %842 = vrot.lane.b32.xlu1 %v1713_v23, %s1888_s1  ;;  %v1715_v27 = vpop.eup %1714 }
 0xafe   :  { %v1717_v8 = vpop.eup %1716  ;;  %v791_v30 = vadd.f32 1.0, %v1715_v27 }
 0xaff   :  { %v835_v31 = vadd.f32 1.0, %v1717_v8 }
 0xb00   :  { %1718 = vrcp.f32 %v791_v30 }
 0xb01   :  { %1720 = vrcp.f32 %v835_v31 }
 0xb0a   :  { %v1719_v34 = vpop.eup %1718 }
 0xb0b   :  { %v1721_v36 = vpop.eup %1720  ;;  %v800_v40 = vmul.f32 %v1719_v34, %v798_v32 }
 0xb6e   :  { %v803_v35 = vpop.permute.xlu0 %802 }
 0xb6f   :  { %v805_v37 = vmul.f32 %v1719_v34, %v803_v35  ;;  %v843_v38 = vpop.permute.xlu1 %842 }
 0xb70   :  { %v845_v39 = vmul.f32 %v1721_v36, %v843_v38 }
 0xb71   :  { %807 = vrot.lane.b32.xlu0 %v805_v37, %s1892_s3 }
 0xb72   :  { %847 = vrot.lane.b32.xlu1 %v845_v39, %s1892_s3 }
 0xbe3   :  { %v808_v41 = vpop.permute.xlu0 %807 }
 0xbe4   :  { %v810_v42 = vadd.f32 %v808_v41, %v800_v40  ;;  %v848_v47 = vpop.permute.xlu1 %847 }
 0xbe6   :  { %1722 = vtanh.f32 %v810_v42  ;;  %818 = vrot.lane.b32.xlu0 %v810_v42, %s1893_s26  ;;  %v1091_v42 = vld [vmem:[#allocation2 + $0x28] sm:$0xf] }
 0xbf0   :  { %v1723_v43 = vpop.eup %1722 }
 0xbf1   :  { %813 = vrot.lane.b32.xlu0 %v1723_v43, %s1888_s1 }
 0xc58   :  { %v819_v44 = vpop.permute.xlu0 %818 }
 0xc59   :  { %821 = vst.msk [vmem:[#allocation4] sm:$0xf] %vm355_vm3, %v819_v44 }
 0xc60   :  { %v839_v45 = vld [vmem:[#allocation4] sm:$0xf] }
 0xc61   :  { %v840_v46 = vmul.f32 %v1721_v36, %v839_v45  ;;  %v1133_v45 = vld [vmem:[#allocation2 + $0x14] sm:$0xf] }
 0xc63   :  { %v814_v48 = vpop.permute.xlu0 %813  ;;  %v850_v49 = vadd.f32 %v848_v47, %v840_v46 }
 0xc64   :  { %v816_v50 = vmul.f32 %v1719_v34, %v814_v48 }
 0xc65   :  { %1724 = vtanh.f32 %v850_v49  ;;  %857 = vst.msk [vmem:[#allocation4] sm:$0xf] %vm391_vm4, %v850_v49 }
 0xc66   :  { %823 = vrot.lane.b32.xlu0 %v816_v50, %s1892_s3 }
 0xc6c   :  { %v949_v55 = vld [vmem:[#allocation4] sm:$0xf] }
 0xc6f   :  { %v1725_v51 = vpop.eup %1724 }
 0xc70   :  { %853 = vrot.lane.b32.xlu1 %v1725_v51, %s1888_s1 }
 0xcd8   :  { %v824_v52 = vpop.permute.xlu0 %823 }
 0xcd9   :  { %826 = vst.msk [vmem:[#allocation3] sm:$0xf] %vm355_vm3, %v824_v52  ;;  %828 = vst.msk [vmem:[#allocation11 + $0xc] sm:$0xf] %vm355_vm3, %v824_v52 }
 0xce2   :  { %v854_v53 = vpop.permute.xlu1 %853 }
 0xce3   :  { %v856_v54 = vmul.f32 %v1721_v36, %v854_v53 }
 0xce5   :  { %859 = vrot.lane.b32.xlu1 %v856_v54, %s1888_s1 }
 0xce9   :  { %951 = vrot.lane.b32.xlu1 %v949_v55, %s1892_s3 }
 0xd57   :  { %v860_v56 = vpop.permute.xlu1 %859 }
 0xd58   :  { %862 = vst.msk [vmem:[#allocation3] sm:$0xf] %vm391_vm4, %v860_v56  ;;  %864 = vst.msk [vmem:[#allocation11 + $0x10] sm:$0xf] %vm391_vm4, %v860_v56 }
 0xd5b   :  { %v952_v10 = vpop.permute.xlu1 %951 }
 0xd5f   :  { %v865_v57 = vld [vmem:[#allocation3] sm:$0xf] }
 0xd60   :  { %1503 = vmatmul.mubr.msk.f32.vlgmr.msra.gmra.mrb[4].mxu1 %vm245_vm2, %v865_v57 }
 0xd61   :  { %1618 = vmatpush1.bf16.msra.mxu1 %v1971_v12  ;;  %1235 = vmatprep.mubr.f32.mxu1 %v1891_v0 }
 0xd62   :  { %1620 = vmatprep.subr.bf16.mxu1 %v1975_v18 }
 0xd65   :  { %1622 = vmatpush1.bf16.msra.mxu1 %v1977_v19 }
 0xd66   :  { %1624 = vmatprep.subr.bf16.mxu1 %v1982_v24 }
 0xd69   :  { %1626 = vmatpush1.bf16.msra.mxu1 %v1987_v28 }
 0xd6a   :  { %1628 = vmatprep.subr.bf16.mxu1 %v1991_v29 }
 0xd6d   :  { %1630 = vmatpush1.bf16.msra.mxu1 %v1997_v33 }
 0xe33   :  { %v935_v58 = vpop.f32.mrb[4].mxu1 }
 0xe34   :  { %v941_v60 = vadd.f32 %v940_v59, %v935_v58  ;;  %v937_v61 = vpop.f32.mrb[5].mxu1 }
 0xe35   :  { %v983_v63 = vadd.f32 %v982_v62, %v937_v61 }
 0xe36   :  { %1726 = vtanh.f32 %v941_v60  ;;  %v1504_v3 = vmul.f32 -1.442695, %v941_v60 }
 0xe37   :  { %1728 = vtanh.f32 %v983_v63  ;;  %v1505_v4 = vmul.f32 -1.442695, %v983_v63 }
 0xe38   :  { %1730 = vpow2.f32 %v1504_v3 }
 0xe39   :  { %1732 = vpow2.f32 %v1505_v4 }
 0xe40   :  { %v1727_v1 = vpop.eup %1726 }
 0xe41   :  { %v1729_v2 = vpop.eup %1728  ;;  %956 = vrot.lane.b32.xlu0 %v1727_v1, %s1888_s1 }
 0xe42   :  { %994 = vrot.lane.b32.xlu1 %v1729_v2, %s1888_s1  ;;  %v1731_v5 = vpop.eup %1730 }
 0xe43   :  { %v1733_v6 = vpop.eup %1732  ;;  %v945_v7 = vadd.f32 1.0, %v1731_v5 }
 0xe44   :  { %v987_v9 = vadd.f32 1.0, %v1733_v6 }
 0xe45   :  { %1734 = vrcp.f32 %v945_v7 }
 0xe46   :  { %1736 = vrcp.f32 %v987_v9 }
 0xe4f   :  { %v1735_v11 = vpop.eup %1734 }
 0xe50   :  { %v1737_v14 = vpop.eup %1736  ;;  %v954_v20 = vmul.f32 %v1735_v11, %v952_v10 }
 0xeb3   :  { %v957_v13 = vpop.permute.xlu0 %956 }
 0xeb4   :  { %v959_v15 = vmul.f32 %v1735_v11, %v957_v13  ;;  %v995_v16 = vpop.permute.xlu1 %994 }
 0xeb5   :  { %v997_v17 = vmul.f32 %v1737_v14, %v995_v16 }
 0xeb6   :  { %961 = vrot.lane.b32.xlu0 %v959_v15, %s1892_s3  ;;  %v1284_v15 = vld [vmem:[#allocation2 + $0xc] sm:$0xf] }
 0xeb7   :  { %999 = vrot.lane.b32.xlu1 %v997_v17, %s1892_s3 }
 0xf28   :  { %v962_v21 = vpop.permute.xlu0 %961 }
 0xf29   :  { %v964_v22 = vadd.f32 %v962_v21, %v954_v20  ;;  %v1000_v8 = vpop.permute.xlu1 %999 }
 0xf2b   :  { %1738 = vtanh.f32 %v964_v22  ;;  %972 = vrot.lane.b32.xlu0 %v964_v22, %s1893_s26 }
 0xf35   :  { %v1739_v23 = vpop.eup %1738 }
 0xf36   :  { %967 = vrot.lane.b32.xlu0 %v1739_v23, %s1888_s1 }
 0xf9d   :  { %v973_v25 = vpop.permute.xlu0 %972 }
 0xf9e   :  { %975 = vst.msk [vmem:[#allocation4] sm:$0xf] %vm355_vm3, %v973_v25 }
 0xfa5   :  { %v991_v26 = vld [vmem:[#allocation4] sm:$0xf] }
 0xfa6   :  { %v992_v27 = vmul.f32 %v1737_v14, %v991_v26 }
 0xfa8   :  { %v968_v30 = vpop.permute.xlu0 %967  ;;  %v1002_v31 = vadd.f32 %v1000_v8, %v992_v27 }
 0xfa9   :  { %v970_v32 = vmul.f32 %v1735_v11, %v968_v30  ;;  %v1242_v11 = vld [vmem:[#allocation2 + $0x30] sm:$0xf] }
 0xfaa   :  { %1740 = vtanh.f32 %v1002_v31  ;;  %1009 = vst.msk [vmem:[#allocation4] sm:$0xf] %vm391_vm4, %v1002_v31 }
 0xfab   :  { %977 = vrot.lane.b32.xlu0 %v970_v32, %s1892_s3 }
 0xfb1   :  { %v1100_v38 = vld [vmem:[#allocation4] sm:$0xf] }
 0xfb4   :  { %v1741_v34 = vpop.eup %1740 }
 0xfb5   :  { %1005 = vrot.lane.b32.xlu1 %v1741_v34, %s1888_s1 }
0x101d   :  { %v978_v35 = vpop.permute.xlu0 %977 }
0x101e   :  { %980 = vst.msk [vmem:[#allocation3] sm:$0xf] %vm355_vm3, %v978_v35  ;;  %981 = vst.msk [vmem:[#allocation11 + $0x10] sm:$0xf] %vm355_vm3, %v978_v35 }
0x1027   :  { %v1006_v36 = vpop.permute.xlu1 %1005 }
0x1028   :  { %v1008_v37 = vmul.f32 %v1737_v14, %v1006_v36 }
0x102a   :  { %1011 = vrot.lane.b32.xlu1 %v1008_v37, %s1888_s1 }
0x102e   :  { %1102 = vrot.lane.b32.xlu1 %v1100_v38, %s1892_s3 }
0x109c   :  { %v1012_v39 = vpop.permute.xlu1 %1011 }
0x109d   :  { %1014 = vst.msk [vmem:[#allocation3] sm:$0xf] %vm391_vm4, %v1012_v39  ;;  %1015 = vst.msk [vmem:[#allocation11 + $0xc] sm:$0xf] %vm391_vm4, %v1012_v39 }
0x10a0   :  { %v1103_v47 = vpop.permute.xlu1 %1102 }
0x10a4   :  { %v1016_v40 = vld [vmem:[#allocation3] sm:$0xf] }
0x10a5   :  { %1506 = vmatmul.mubr.msk.f32.vlgmr.msra.gmra.mrb[12].mxu0 %vm245_vm2, %v1016_v40 }
0x10a6   :  { %1634 = vmatpush1.bf16.msra.mxu0 %v1971_v12  ;;  %1386 = vmatprep.mubr.f32.mxu0 %v1891_v0 }
0x10a7   :  { %1636 = vmatprep.subr.bf16.mxu0 %v1975_v18 }
0x10aa   :  { %1638 = vmatpush1.bf16.msra.mxu0 %v1977_v19 }
0x10ab   :  { %1640 = vmatprep.subr.bf16.mxu0 %v1982_v24 }
0x10ae   :  { %1642 = vmatpush1.bf16.msra.mxu0 %v1987_v28 }
0x10af   :  { %1644 = vmatprep.subr.bf16.mxu0 %v1991_v29 }
0x10b2   :  { %1646 = vmatpush1.bf16.msra.mxu0 %v1997_v33 }
0x1178   :  { %v1086_v41 = vpop.f32.mrb[12].mxu0 }
0x1179   :  { %v1092_v43 = vadd.f32 %v1091_v42, %v1086_v41  ;;  %v1088_v44 = vpop.f32.mrb[13].mxu0 }
0x117a   :  { %v1134_v12 = vadd.f32 %v1133_v45, %v1088_v44 }
0x117b   :  { %1742 = vtanh.f32 %v1092_v43  ;;  %v1507_v19 = vmul.f32 -1.442695, %v1092_v43 }
0x117c   :  { %1744 = vtanh.f32 %v1134_v12  ;;  %v1508_v24 = vmul.f32 -1.442695, %v1134_v12 }
0x117d   :  { %1746 = vpow2.f32 %v1507_v19 }
0x117e   :  { %1748 = vpow2.f32 %v1508_v24 }
0x1185   :  { %v1743_v0 = vpop.eup %1742 }
0x1186   :  { %v1745_v18 = vpop.eup %1744  ;;  %1107 = vrot.lane.b32.xlu0 %v1743_v0, %s1888_s1 }
0x1187   :  { %1145 = vrot.lane.b32.xlu1 %v1745_v18, %s1888_s1  ;;  %v1747_v28 = vpop.eup %1746 }
0x1188   :  { %v1749_v29 = vpop.eup %1748  ;;  %v1096_v33 = vadd.f32 1.0, %v1747_v28 }
0x1189   :  { %v1138_v46 = vadd.f32 1.0, %v1749_v29 }
0x118a   :  { %1750 = vrcp.f32 %v1096_v33 }
0x118b   :  { %1752 = vrcp.f32 %v1138_v46 }
0x1194   :  { %v1751_v48 = vpop.eup %1750 }
0x1195   :  { %v1753_v50 = vpop.eup %1752  ;;  %v1105_v54 = vmul.f32 %v1751_v48, %v1103_v47 }
0x11f8   :  { %v1108_v49 = vpop.permute.xlu0 %1107 }
0x11f9   :  { %v1110_v51 = vmul.f32 %v1751_v48, %v1108_v49  ;;  %v1146_v52 = vpop.permute.xlu1 %1145 }
0x11fa   :  { %v1148_v53 = vmul.f32 %v1753_v50, %v1146_v52 }
0x11fb   :  { %1112 = vrot.lane.b32.xlu0 %v1110_v51, %s1892_s3  ;;  %v1435_v51 = vld [vmem:[#allocation2 + $0x4] sm:$0xf] }
0x11fc   :  { %1150 = vrot.lane.b32.xlu1 %v1148_v53, %s1892_s3 }
0x126d   :  { %v1113_v55 = vpop.permute.xlu0 %1112 }
0x126e   :  { %v1115_v56 = vadd.f32 %v1113_v55, %v1105_v54  ;;  %v1151_v61 = vpop.permute.xlu1 %1150 }
0x1270   :  { %1754 = vtanh.f32 %v1115_v56  ;;  %1123 = vrot.lane.b32.xlu0 %v1115_v56, %s1893_s26 }
0x127a   :  { %v1755_v57 = vpop.eup %1754 }
0x127b   :  { %1118 = vrot.lane.b32.xlu0 %v1755_v57, %s1888_s1 }
0x12e2   :  { %v1124_v58 = vpop.permute.xlu0 %1123 }
0x12e3   :  { %1126 = vst.msk [vmem:[#allocation4] sm:$0xf] %vm355_vm3, %v1124_v58 }
0x12ea   :  { %v1142_v59 = vld [vmem:[#allocation4] sm:$0xf] }
0x12eb   :  { %v1143_v60 = vmul.f32 %v1753_v50, %v1142_v59 }
0x12ed   :  { %v1119_v62 = vpop.permute.xlu0 %1118  ;;  %v1153_v63 = vadd.f32 %v1151_v61, %v1143_v60 }
0x12ee   :  { %v1121_v1 = vmul.f32 %v1751_v48, %v1119_v62  ;;  %v1393_v48 = vld [vmem:[#allocation2 + $0x38] sm:$0xf] }
0x12ef   :  { %1756 = vtanh.f32 %v1153_v63  ;;  %1160 = vst.msk [vmem:[#allocation4] sm:$0xf] %vm391_vm4, %v1153_v63 }
0x12f0   :  { %1128 = vrot.lane.b32.xlu0 %v1121_v1, %s1892_s3 }
0x12f6   :  { %v1251_v6 = vld [vmem:[#allocation4] sm:$0xf] }
0x12f9   :  { %v1757_v2 = vpop.eup %1756 }
0x12fa   :  { %1156 = vrot.lane.b32.xlu1 %v1757_v2, %s1888_s1 }
0x1362   :  { %v1129_v3 = vpop.permute.xlu0 %1128 }
0x1363   :  { %1131 = vst.msk [vmem:[#allocation3] sm:$0xf] %vm355_vm3, %v1129_v3  ;;  %1132 = vst.msk [vmem:[#allocation11 + $0x14] sm:$0xf] %vm355_vm3, %v1129_v3 }
0x136c   :  { %v1157_v4 = vpop.permute.xlu1 %1156 }
0x136d   :  { %v1159_v5 = vmul.f32 %v1753_v50, %v1157_v4 }
0x136f   :  { %1162 = vrot.lane.b32.xlu1 %v1159_v5, %s1888_s1 }
0x1373   :  { %1253 = vrot.lane.b32.xlu1 %v1251_v6, %s1892_s3 }
0x13e1   :  { %v1163_v7 = vpop.permute.xlu1 %1162 }
0x13e2   :  { %1165 = vst.msk [vmem:[#allocation3] sm:$0xf] %vm391_vm4, %v1163_v7  ;;  %1166 = vst.msk [vmem:[#allocation11 + $0x8] sm:$0xf] %vm391_vm4, %v1163_v7 }
0x13e5   :  { %v1254_v8 = vpop.permute.xlu1 %1253 }
0x13e9   :  { %v1167_v9 = vld [vmem:[#allocation3] sm:$0xf] }
0x13ea   :  { %1509 = vmatmul.mubr.msk.f32.vlgmr.msra.gmra.mrb[6].mxu1 %vm245_vm2, %v1167_v9 }
0x14bd   :  { %v1237_v10 = vpop.f32.mrb[6].mxu1 }
0x14be   :  { %v1243_v13 = vadd.f32 %v1242_v11, %v1237_v10  ;;  %v1239_v14 = vpop.f32.mrb[7].mxu1 }
0x14bf   :  { %v1285_v16 = vadd.f32 %v1284_v15, %v1239_v14 }
0x14c0   :  { %1758 = vtanh.f32 %v1243_v13  ;;  %v1510_v21 = vmul.f32 -1.442695, %v1243_v13 }
0x14c1   :  { %1760 = vtanh.f32 %v1285_v16  ;;  %v1511_v22 = vmul.f32 -1.442695, %v1285_v16 }
0x14c2   :  { %1762 = vpow2.f32 %v1510_v21 }
0x14c3   :  { %1764 = vpow2.f32 %v1511_v22 }
0x14ca   :  { %v1759_v17 = vpop.eup %1758 }
0x14cb   :  { %v1761_v20 = vpop.eup %1760  ;;  %1258 = vrot.lane.b32.xlu0 %v1759_v17, %s1888_s1 }
0x14cc   :  { %1296 = vrot.lane.b32.xlu1 %v1761_v20, %s1888_s1  ;;  %v1763_v23 = vpop.eup %1762 }
0x14cd   :  { %v1765_v25 = vpop.eup %1764  ;;  %v1247_v26 = vadd.f32 1.0, %v1763_v23 }
0x14ce   :  { %v1289_v27 = vadd.f32 1.0, %v1765_v25 }
0x14cf   :  { %1766 = vrcp.f32 %v1247_v26 }
0x14d0   :  { %1768 = vrcp.f32 %v1289_v27 }
0x14d9   :  { %v1767_v30 = vpop.eup %1766 }
0x14da   :  { %v1769_v32 = vpop.eup %1768  ;;  %v1256_v37 = vmul.f32 %v1767_v30, %v1254_v8 }
0x153d   :  { %v1259_v31 = vpop.permute.xlu0 %1258 }
0x153e   :  { %v1261_v34 = vmul.f32 %v1767_v30, %v1259_v31  ;;  %v1297_v35 = vpop.permute.xlu1 %1296 }
0x153f   :  { %v1299_v36 = vmul.f32 %v1769_v32, %v1297_v35 }
0x1540   :  { %1263 = vrot.lane.b32.xlu0 %v1261_v34, %s1892_s3 }
0x1541   :  { %1301 = vrot.lane.b32.xlu1 %v1299_v36, %s1892_s3 }
0x15b2   :  { %v1264_v38 = vpop.permute.xlu0 %1263 }
0x15b3   :  { %v1266_v39 = vadd.f32 %v1264_v38, %v1256_v37  ;;  %v1302_v44 = vpop.permute.xlu1 %1301 }
0x15b5   :  { %1770 = vtanh.f32 %v1266_v39  ;;  %1274 = vrot.lane.b32.xlu0 %v1266_v39, %s1893_s26 }
0x15bf   :  { %v1771_v40 = vpop.eup %1770 }
0x15c0   :  { %1269 = vrot.lane.b32.xlu0 %v1771_v40, %s1888_s1 }
0x1627   :  { %v1275_v41 = vpop.permute.xlu0 %1274 }
0x1628   :  { %1277 = vst.msk [vmem:[#allocation4] sm:$0xf] %vm355_vm3, %v1275_v41 }
0x162f   :  { %v1293_v42 = vld [vmem:[#allocation4] sm:$0xf] }
0x1630   :  { %v1294_v43 = vmul.f32 %v1769_v32, %v1293_v42 }
0x1632   :  { %v1270_v45 = vpop.permute.xlu0 %1269  ;;  %v1304_v12 = vadd.f32 %v1302_v44, %v1294_v43 }
0x1633   :  { %v1272_v0 = vmul.f32 %v1767_v30, %v1270_v45 }
0x1634   :  { %1772 = vtanh.f32 %v1304_v12  ;;  %1311 = vst.msk [vmem:[#allocation4] sm:$0xf] %vm391_vm4, %v1304_v12 }
0x1635   :  { %1279 = vrot.lane.b32.xlu0 %v1272_v0, %s1892_s3 }
0x163b   :  { %v1402_v29 = vld [vmem:[#allocation4] sm:$0xf] }
0x163e   :  { %v1773_v18 = vpop.eup %1772 }
0x163f   :  { %1307 = vrot.lane.b32.xlu1 %v1773_v18, %s1888_s1 }
0x16a7   :  { %v1280_v19 = vpop.permute.xlu0 %1279 }
0x16a8   :  { %1282 = vst.msk [vmem:[#allocation3] sm:$0xf] %vm355_vm3, %v1280_v19  ;;  %1283 = vst.msk [vmem:[#allocation11 + $0x18] sm:$0xf] %vm355_vm3, %v1280_v19 }
0x16b1   :  { %v1308_v24 = vpop.permute.xlu1 %1307 }
0x16b2   :  { %v1310_v28 = vmul.f32 %v1769_v32, %v1308_v24 }
0x16b4   :  { %1313 = vrot.lane.b32.xlu1 %v1310_v28, %s1888_s1 }
0x16b8   :  { %1404 = vrot.lane.b32.xlu1 %v1402_v29, %s1892_s3 }
0x1726   :  { %v1314_v33 = vpop.permute.xlu1 %1313 }
0x1727   :  { %1316 = vst.msk [vmem:[#allocation3] sm:$0xf] %vm391_vm4, %v1314_v33  ;;  %1317 = vst.msk [vmem:[#allocation11 + $0x4] sm:$0xf] %vm391_vm4, %v1314_v33 }
0x172a   :  { %v1405_v61 = vpop.permute.xlu1 %1404 }
0x172e   :  { %v1318_v46 = vld [vmem:[#allocation3] sm:$0xf] }
0x172f   :  { %1512 = vmatmul.mubr.msk.f32.vlgmr.msra.gmra.mrb[14].mxu0 %vm245_vm2, %v1318_v46 }
0x1802   :  { %v1388_v47 = vpop.f32.mrb[14].mxu0 }
0x1803   :  { %v1394_v49 = vadd.f32 %v1393_v48, %v1388_v47  ;;  %v1390_v50 = vpop.f32.mrb[15].mxu0 }
0x1804   :  { %v1436_v52 = vadd.f32 %v1435_v51, %v1390_v50 }
0x1805   :  { %1774 = vtanh.f32 %v1394_v49  ;;  %v1513_v55 = vmul.f32 -1.442695, %v1394_v49 }
0x1806   :  { %1776 = vtanh.f32 %v1436_v52  ;;  %v1514_v56 = vmul.f32 -1.442695, %v1436_v52 }
0x1807   :  { %1778 = vpow2.f32 %v1513_v55 }
0x1808   :  { %1780 = vpow2.f32 %v1514_v56 }
0x180f   :  { %v1775_v53 = vpop.eup %1774 }
0x1810   :  { %v1777_v54 = vpop.eup %1776  ;;  %1409 = vrot.lane.b32.xlu0 %v1775_v53, %s1888_s1 }
0x1811   :  { %1447 = vrot.lane.b32.xlu1 %v1777_v54, %s1888_s1  ;;  %v1779_v57 = vpop.eup %1778 }
0x1812   :  { %v1781_v58 = vpop.eup %1780  ;;  %v1398_v59 = vadd.f32 1.0, %v1779_v57 }
0x1813   :  { %v1440_v60 = vadd.f32 1.0, %v1781_v58 }
0x1814   :  { %1782 = vrcp.f32 %v1398_v59 }
0x1815   :  { %1784 = vrcp.f32 %v1440_v60 }
0x181e   :  { %v1783_v62 = vpop.eup %1782 }
0x181f   :  { %v1785_v1 = vpop.eup %1784  ;;  %v1407_v5 = vmul.f32 %v1783_v62, %v1405_v61 }
0x1882   :  { %v1410_v63 = vpop.permute.xlu0 %1409 }
0x1883   :  { %v1412_v2 = vmul.f32 %v1783_v62, %v1410_v63  ;;  %v1448_v3 = vpop.permute.xlu1 %1447 }
0x1884   :  { %v1450_v4 = vmul.f32 %v1785_v1, %v1448_v3 }
0x1885   :  { %1414 = vrot.lane.b32.xlu0 %v1412_v2, %s1892_s3 }
0x1886   :  { %1452 = vrot.lane.b32.xlu1 %v1450_v4, %s1892_s3 }
0x18f7   :  { %v1415_v6 = vpop.permute.xlu0 %1414 }
0x18f8   :  { %v1417_v7 = vadd.f32 %v1415_v6, %v1407_v5  ;;  %v1453_v14 = vpop.permute.xlu1 %1452 }
0x18fa   :  { %1786 = vtanh.f32 %v1417_v7  ;;  %1425 = vrot.lane.b32.xlu0 %v1417_v7, %s1893_s26 }
0x1904   :  { %v1787_v9 = vpop.eup %1786 }
0x1905   :  { %1420 = vrot.lane.b32.xlu0 %v1787_v9, %s1888_s1 }
0x196c   :  { %v1426_v10 = vpop.permute.xlu0 %1425 }
0x196d   :  { %1428 = vst.msk [vmem:[#allocation4] sm:$0xf] %vm355_vm3, %v1426_v10 }
0x1974   :  { %v1444_v11 = vld [vmem:[#allocation4] sm:$0xf] }
0x1975   :  { %v1445_v13 = vmul.f32 %v1785_v1, %v1444_v11 }
0x1977   :  { %v1421_v15 = vpop.permute.xlu0 %1420  ;;  %v1455_v16 = vadd.f32 %v1453_v14, %v1445_v13 }
0x1978   :  { %v1423_v17 = vmul.f32 %v1783_v62, %v1421_v15 }
0x1979   :  { %1788 = vtanh.f32 %v1455_v16  ;;  %1462 = vst.msk [vmem:[#allocation4] sm:$0xf] %vm391_vm4, %v1455_v16 }
0x197a   :  { %1430 = vrot.lane.b32.xlu0 %v1423_v17, %s1892_s3 }
0x1983   :  { %v1789_v20 = vpop.eup %1788 }
0x1984   :  { %1458 = vrot.lane.b32.xlu1 %v1789_v20, %s1888_s1 }
0x19ec   :  { %v1431_v21 = vpop.permute.xlu0 %1430 }
0x19ed   :  { %1433 = vst.msk [vmem:[#allocation3] sm:$0xf] %vm355_vm3, %v1431_v21  ;;  %1434 = vst.msk [vmem:[#allocation11 + $0x1c] sm:$0xf] %vm355_vm3, %v1431_v21 }
0x19f6   :  { %v1459_v22 = vpop.permute.xlu1 %1458 }
0x19f7   :  { %v1461_v23 = vmul.f32 %v1785_v1, %v1459_v22 }
0x19f9   :  { %1464 = vrot.lane.b32.xlu1 %v1461_v23, %s1888_s1 }
0x1a6b   :  { %v1465_v25 = vpop.permute.xlu1 %1464 }
0x1a6c   :  { %1467 = vst.msk [vmem:[#allocation3] sm:$0xf] %vm391_vm4, %v1465_v25  ;;  %1468 = vst.msk [vmem:[#allocation11] sm:$0xf] %vm391_vm4, %v1465_v25 }
0x1a6d   :  { %1867 = shalt.err (!%p1864_p0)
}
0x1a6e   :  { %s1868_s8 = scalar_lea.hbm %s2221_s4, 512 }
0x1a6f   :  { %p1869_p1 = scmp.ne.s32.totalorder %s2221_s4, %s1868_s8  ;;  %p1872_p2 = scmp.lt.u32.totalorder %s1868_s8, %s2221_s4 }
0x1a71   :  { %p1874_p3 = pnand %p1872_p2, %p1869_p1 }
0x1a73   :  { %1877 = shalt.err (!%p1874_p3)
}
0x1a74   :  { %1480 = dma.vmem_to_hbm [thread:$0]  %s1475_s30, 512, %s2221_s4, [#allocation7], %s1888_s1, %s1888_s1, %s1889_s13  }
0x1a75   :  { %1882 = dma.done.wait [#allocation7], 512  }
0x1a76   :  { %1883 = vsyncadd [#allocation7], 4294966784 }
0x1a77   :  { %1484 = vsyncpa [#allocation6], 1 }
0x1a78   :  { %1485 = vsyncpa [#allocation9], 1 }
0x1a79   :  { %1486 = vsyncpa [#allocation7], 1 }

</bundles_post_ra>
